<compile_context>
chip_gen: v5e
topology: v5e:2x2
jax: 0.10.0
libtpu: 0.0.40
codegen_flags: <defaults>
</compile_context>

<pallas_src>
import functools

import jax
import jax.numpy as jnp
from jax.experimental import pallas as pl
from jax.experimental.pallas import tpu as pltpu

LEAKY_SLOPE = 0.01   # PyTorch nn.LeakyReLU default
LATENT_DIM = 40
_TM = 512            # M tile for the gridded conv GEMMs (grid only when M > _TM)


def _leaky_relu(x):
    return jnp.where(x >= 0.0, x, LEAKY_SLOPE * x)


# ---------------------------------------------------------------------------
# Pallas kernels
# ---------------------------------------------------------------------------

def _gemm_bias_act_kernel(x_ref, w_ref, b_ref, o_ref, *, act):
    """o = act(x @ w + b); bf16/f32 operands, f32 accumulate, f32 epilogue."""
    acc = jnp.dot(x_ref[...], w_ref[...], preferred_element_type=jnp.float32)
    acc = acc + b_ref[...]                       # (1, N) f32 broadcasts over M
    if act == "leaky_relu":
        acc = _leaky_relu(acc)
    elif act == "sigmoid":
        acc = jax.nn.sigmoid(acc)
    o_ref[...] = acc.astype(o_ref.dtype)


def matmul_bias_act(x, w, b2d, act="none"):
    """Fused GEMM + bias + activation.  x:(M,K), w:(K,N), b2d:(1,N) f32."""
    M, K = x.shape
    K2, N = w.shape
    assert K == K2 and b2d.shape == (1, N)
    kernel = functools.partial(_gemm_bias_act_kernel, act=act)
    cost = pl.CostEstimate(
        flops=2 * M * K * N,
        transcendentals=M * N if act == "sigmoid" else 0,
        bytes_accessed=int(x.size * x.dtype.itemsize
                           + w.size * w.dtype.itemsize
                           + b2d.size * 4 + M * N * 4))
    fusion = [True, False, False]  # fuse im2col slicing into the patches operand

    if M > _TM:
        # Grid over M: shards across TensorCores on v7x and bounds VMEM usage.
        Mp = pl.cdiv(M, _TM) * _TM
        xp = jnp.pad(x, ((0, Mp - M), (0, 0))) if Mp != M else x
        out = pl.pallas_call(
            kernel,
            out_shape=jax.ShapeDtypeStruct((Mp, N), jnp.float32),
            grid=(Mp // _TM,),
            in_specs=[
                pl.BlockSpec((_TM, K), lambda i: (i, 0)),
                pl.BlockSpec((K, N), lambda i: (0, 0)),
                pl.BlockSpec((1, N), lambda i: (0, 0)),
            ],
            out_specs=pl.BlockSpec((_TM, N), lambda i: (i, 0)),
            compiler_params=pltpu.CompilerParams(
                dimension_semantics=("parallel",),
                allow_input_fusion=fusion),
            cost_estimate=cost,
        )(xp, w, b2d)
        return out[:M]

    # Small M: single full-array VMEM block, no grid (launch-bound regime).
    return pl.pallas_call(
        kernel,
        out_shape=jax.ShapeDtypeStruct((M, N), jnp.float32),
        in_specs=[pl.BlockSpec(memory_space=pltpu.MemorySpace.VMEM)] * 3,
        out_specs=pl.BlockSpec(memory_space=pltpu.MemorySpace.VMEM),
        compiler_params=pltpu.CompilerParams(allow_input_fusion=fusion),
        cost_estimate=cost,
    )(x, w, b2d)


def _dense_chain_kernel(h_ref, eps_ref, we_ref, be_ref, w1_ref, b1_ref,
                        wmu_ref, bmu_ref, wlv_ref, blv_ref, wdec_ref, bdec_ref,
                        o_ref):
    """Fused: enc_fc -> fc_1 -> {fc_mu, fc_logvar} -> reparameterize -> fc_dec.

    All intermediates stay in VMEM/vregs; one lane-dense slab is stored:
    [mu | logvar | z | fc_dec(z) | zero pad] along the lane dim."""
    f32 = jnp.float32
    enc = _leaky_relu(jnp.dot(h_ref[...], we_ref[...],
                              preferred_element_type=f32) + be_ref[...])
    h1 = _leaky_relu(jnp.dot(enc, w1_ref[...],
                             preferred_element_type=f32) + b1_ref[...])
    mu = jnp.dot(h1, wmu_ref[...], preferred_element_type=f32) + bmu_ref[...]
    lv = jnp.dot(h1, wlv_ref[...], preferred_element_type=f32) + blv_ref[...]
    z = mu + jnp.exp(0.5 * lv) * eps_ref[...]
    dec = jnp.dot(z, wdec_ref[...], preferred_element_type=f32) + bdec_ref[...]

    parts = [mu, lv, z, dec]
    used = 3 * mu.shape[1] + dec.shape[1]
    rem = o_ref.shape[1] - used
    if rem > 0:
        parts.append(jnp.zeros((mu.shape[0], rem), f32))
    o_ref[...] = jnp.concatenate(parts, axis=-1)


def dense_latent_chain(h_flat, eps, dense_params):
    """One pallas_call for the whole MLP/latent chain (vs. 6-7 separate GEMMs)."""
    (we, be), (w1, b1), (wmu, bmu), (wlv, blv), (wdec, bdec) = dense_params
    B = h_flat.shape[0]
    L = wmu.shape[1]
    D = wdec.shape[1]
    used = 3 * L + D
    slab_w = max(128, ((used + 127) // 128) * 128)   # lane-dense output slab
    slab = pl.pallas_call(
        _dense_chain_kernel,
        out_shape=jax.ShapeDtypeStruct((B, slab_w), jnp.float32),
        in_specs=[pl.BlockSpec(memory_space=pltpu.MemorySpace.VMEM)] * 12,
        out_specs=pl.BlockSpec(memory_space=pltpu.MemorySpace.VMEM),
    )(h_flat.astype(jnp.float32), eps,
      we, be, w1, b1, wmu, bmu, wlv, blv, wdec, bdec)
    mu = slab[:, 0:L]
    logvar = slab[:, L:2 * L]
    z = slab[:, 2 * L:3 * L]
    dec_pre = slab[:, 3 * L:3 * L + D]
    return mu, logvar, z, dec_pre


# ---------------------------------------------------------------------------
# Conv glue (im2col / col2im are layout plumbing; the hot GEMM runs in Pallas)
# ---------------------------------------------------------------------------

def _im2col(x_nhwc, k, stride):
    """k x k patches, stride s, padding 0; feature order (kh, kw, c)."""
    N, H, W, C = x_nhwc.shape
    OH = (H - k) // stride + 1
    OW = (W - k) // stride + 1
    cols = []
    for i in range(k):
        for j in range(k):
            cols.append(x_nhwc[:, i:i + stride * (OH - 1) + 1:stride,
                                  j:j + stride * (OW - 1) + 1:stride, :])
    patches = jnp.concatenate(cols, axis=-1)          # (N, OH, OW, k*k*C)
    return patches.reshape(N * OH * OW, k * k * C), OH, OW


def conv2d(x_nhwc, wmat, b2d, stride, act, gemm_dtype):
    """PyTorch Conv2d(k=3, s=stride, p=0) = im2col + fused Pallas GEMM.
    wmat is the pre-laid-out (k*k*IC, OC) weight in (kh, kw, ic) order."""
    N = x_nhwc.shape[0]
    OC = wmat.shape[1]
    patches, OH, OW = _im2col(x_nhwc.astype(gemm_dtype), 3, stride)
    out = matmul_bias_act(patches, wmat, b2d, act)
    # TODO(synk): OC < 128 means masked stores on the GEMM output; at these
    # shapes the in-kernel (M,OC)->(M/g, g*OC) lane-densify reshape isn't worth
    # the extra cross-lane shuffle.  Revisit for large batches.
    return out.reshape(N, OH, OW, OC)


def conv_transpose2d(x_nhwc, wmat, b2d, stride, output_padding, act, gemm_dtype):
    """PyTorch ConvTranspose2d(k=3, s=stride, p=0, output_padding=op).

    Dense formulation (no zero-dilated input is ever materialized):
      cols = x_flat @ W      (M = N*H*W rows, K = IC -- zero waste on the MXU)
      out[s*iy+ky, s*ix+kx] += cols[iy, ix, ky, kx]  (9-tap col2im scatter-add)
    The scatter-add + bias + activation epilogue is left to XLA: at these sizes
    an extra Pallas launch would cost more than the elementwise work it fuses.
    """
    N, H, W, IC = x_nhwc.shape
    k = 3
    OC = b2d.shape[1]
    x_flat = x_nhwc.reshape(N * H * W, IC).astype(gemm_dtype)
    zero_b = jnp.zeros((1, k * k * OC), jnp.float32)  # bias added after scatter
    cols = matmul_bias_act(x_flat, wmat, zero_b, act="none")   # (M, 9*OC) f32
    cols = cols.reshape(N, H, W, k, k, OC)

    OH = (H - 1) * stride + k + output_padding
    OW = (W - 1) * stride + k + output_padding
    out = jnp.zeros((N, OH, OW, OC), jnp.float32)
    for ky in range(k):
        for kx in range(k):
            out = out.at[:, ky:ky + stride * (H - 1) + 1:stride,
                            kx:kx + stride * (W - 1) + 1:stride, :].add(
                cols[:, :, :, ky, kx, :])
    out = out + b2d.reshape(1, 1, 1, OC)
    if act == "leaky_relu":
        out = _leaky_relu(out)
    elif act == "sigmoid":
        out = jax.nn.sigmoid(out)
    return out


# ---------------------------------------------------------------------------
# Parameters: synthetic init (PyTorch layouts) + one-time GEMM re-layout
# ---------------------------------------------------------------------------

def init_ssvae_params(key, im_size, enc_dim, channel_dims, in_channels=1):
    """Deterministic synthetic params in PyTorch layouts (Conv: OIHW,
    ConvTranspose: IOHW, Linear: (out, in)).  fc_logvar is zero-initialized,
    matching nn.init.zeros_ in the reference module."""
    last_channel = channel_dims[-1]
    new_size = im_size // 2 ** len(channel_dims) - 1

    def dense(k, out_f, in_f, scale=0.08):
        kw, kb = jax.random.split(k)
        return (scale * jax.random.normal(kw, (out_f, in_f), jnp.float32),
                scale * jax.random.normal(kb, (out_f,), jnp.float32))

    keys = iter(jax.random.split(key, 16))
    raw = {}

    enc_convs = []
    prev = in_channels
    for c in channel_dims:
        kw, kb = jax.random.split(next(keys))
        enc_convs.append((0.1 * jax.random.normal(kw, (c, prev, 3, 3), jnp.float32),
                          0.1 * jax.random.normal(kb, (c,), jnp.float32)))
        prev = c
    raw["enc_convs"] = enc_convs
    raw["enc_fc"] = dense(next(keys), enc_dim, last_channel * new_size * new_size)
    raw["fc_1"] = dense(next(keys), LATENT_DIM, enc_dim)
    raw["fc_mu"] = dense(next(keys), LATENT_DIM, LATENT_DIM)
    raw["fc_logvar"] = (jnp.zeros((LATENT_DIM, LATENT_DIM), jnp.float32),
                        jnp.zeros((LATENT_DIM,), jnp.float32))
    raw["fc_dec"] = dense(next(keys), last_channel * new_size * new_size, LATENT_DIM)

    chain = list(reversed(channel_dims)) + [in_channels]
    dec = []
    for i in range(len(chain) - 1):
        kw, kb = jax.random.split(next(keys))
        dec.append((0.1 * jax.random.normal(kw, (chain[i], chain[i + 1], 3, 3),
                                            jnp.float32),
                    0.1 * jax.random.normal(kb, (chain[i + 1],), jnp.float32)))
    raw["dec_convts"] = dec
    return raw


def prepare_params(raw, use_bf16=True):
    """One-time re-layout into (K, N) GEMM layouts so the jitted hot path runs
    zero per-step weight transposes.  Conv GEMM operands go to bf16 (MXU-native
    on v6e/v7x); biases and the tiny dense latent chain stay f32."""
    gdt = jnp.bfloat16 if use_bf16 else jnp.float32
    p = {}
    # Conv2d OIHW -> (kh*kw*ic, oc), matching _im2col's (kh, kw, c) order.
    p["enc_convs"] = [
        (jnp.transpose(w, (2, 3, 1, 0)).reshape(-1, w.shape[0]).astype(gdt),
         b.reshape(1, -1).astype(jnp.float32))
        for (w, b) in raw["enc_convs"]]
    # Linear (out, in) -> (in, out), f32.
    p["dense"] = tuple(
        (jnp.transpose(raw[name][0]).astype(jnp.float32),
         raw[name][1].reshape(1, -1).astype(jnp.float32))
        for name in ("enc_fc", "fc_1", "fc_mu", "fc_logvar", "fc_dec"))
    # ConvTranspose2d IOHW -> (ic, kh*kw*oc) for the dense scatter GEMM.
    p["dec_convts"] = [
        (jnp.transpose(w, (0, 2, 3, 1)).reshape(w.shape[0], -1).astype(gdt),
         b.reshape(1, -1).astype(jnp.float32))
        for (w, b) in raw["dec_convts"]]
    return p


# ---------------------------------------------------------------------------
# SSVAE forward (static shape config closed over -> no traced reshapes)
# ---------------------------------------------------------------------------

def make_ssvae_forward(im_size, enc_dim, channel_dims, in_channels=1,
                       use_bf16=True):
    last_channel = channel_dims[-1]
    new_size = im_size // 2 ** len(channel_dims) - 1
    gdt = jnp.bfloat16 if use_bf16 else jnp.float32
    n_dec = len(channel_dims)

    def forward(params, x_nchw, eps_key):
        B = x_nchw.shape[0]
        # NCHW -> NHWC for the conv path
        h = jnp.transpose(x_nchw, (0, 2, 3, 1)).astype(jnp.float32)

        # ---- ImageEncoder: len(channel_dims) x (Conv2d k3 s2 p0 + LeakyReLU) ----
        for wmat, b2d in params["enc_convs"]:
            h = conv2d(h, wmat, b2d, stride=2, act="leaky_relu", gemm_dtype=gdt)
        # flatten in PyTorch (C, H, W) order
        h = jnp.transpose(h, (0, 3, 1, 2)).reshape(B, -1)

        # ---- fused dense / latent chain (ONE Pallas kernel) ----
        eps = jax.random.normal(eps_key, (B, LATENT_DIM), jnp.float32)
        mu, logvar, z, dec_pre = dense_latent_chain(h, eps, params["dense"])

        # ---- Decoder: ConvTranspose2d k3 s2 stack (last: op=1 + Sigmoid) ----
        d = dec_pre.reshape(B, last_channel, new_size, new_size)
        d = jnp.transpose(d, (0, 2, 3, 1))
        for i, (wmat, b2d) in enumerate(params["dec_convts"]):
            last = (i == n_dec - 1)
            d = conv_transpose2d(d, wmat, b2d, stride=2,
                                 output_padding=1 if last else 0,
                                 act="sigmoid" if last else "leaky_relu",
                                 gemm_dtype=gdt)

        x_hat = jnp.transpose(d, (0, 3, 1, 2))   # back to NCHW
        return x_hat, z, mu, logvar

    return forward


# ---------------------------------------------------------------------------
# Demo
# ---------------------------------------------------------------------------

if __name__ == "__main__":
    im_size = 32
    enc_dim = 32
    channel_dims = [8, 16, 32, 64]
    batch = 2
    in_channels = 1

    root = jax.random.PRNGKey(0)
    k_param, k_data, k_eps = jax.random.split(root, 3)

    raw = init_ssvae_params(k_param, im_size, enc_dim, channel_dims,
                            in_channels=in_channels)
    params = prepare_params(raw, use_bf16=True)
    x = jax.random.uniform(k_data, (batch, in_channels, im_size, im_size),
                           jnp.float32)

    forward = make_ssvae_forward(im_size, enc_dim, channel_dims,
                                 in_channels=in_channels, use_bf16=True)
    fwd = jax.jit(forward)
    x_hat, z, mu, logvar = fwd(params, x, k_eps)
    jax.block_until_ready((x_hat, z, mu, logvar))

    assert x_hat.shape == (batch, in_channels, im_size, im_size), x_hat.shape
    assert z.shape == (batch, LATENT_DIM) and mu.shape == (batch, LATENT_DIM) \
        and logvar.shape == (batch, LATENT_DIM)
    # fc_logvar weight/bias initialized to zero -> logvar must be exactly 0,
    # and z must therefore equal mu + eps (exp(0) = 1).
    assert bool(jnp.all(logvar == 0.0))
    assert bool(jnp.all(jnp.isfinite(x_hat)))
    assert bool(jnp.all((x_hat >= 0.0) & (x_hat <= 1.0)))   # sigmoid output

    print("KERNEL_OK")
</pallas_src>

<mosaic_0001>
module attributes {stable_mosaic.version = 11 : i64} {
  func.func @_gemm_bias_act_kernel(%arg0: memref<450x9xbf16, #tpu.memory_space<vmem>>, %arg1: memref<9x8xbf16, #tpu.memory_space<vmem>>, %arg2: memref<1x8xf32, #tpu.memory_space<vmem>>, %arg3: memref<450x8xf32, #tpu.memory_space<vmem>>) attributes {dimension_semantics = [], scalar_prefetch = 0 : i64, scratch_operands = 0 : i64, tpu.core_type = #tpu.core_type<tc>} {
    %c0 = arith.constant 0 : index
    %c0_0 = arith.constant 0 : index
    %0 = vector.load %arg0[%c0, %c0_0] : memref<450x9xbf16, #tpu.memory_space<vmem>>, vector<450x9xbf16>
    %c0_1 = arith.constant 0 : index
    %c0_2 = arith.constant 0 : index
    %1 = vector.load %arg1[%c0_1, %c0_2] : memref<9x8xbf16, #tpu.memory_space<vmem>>, vector<9x8xbf16>
    %cst = arith.constant dense<0.000000e+00> : vector<450x8xf32>
    %2 = tpu.matmul %0, %1, %cst {dimension_numbers = #tpu.dot_dimension_numbers<[1], [0], [0], [1], [0, 0, 1, 1], [], []>} : vector<450x9xbf16>, vector<9x8xbf16>, vector<450x8xf32> -> vector<450x8xf32>
    %c0_3 = arith.constant 0 : index
    %c0_4 = arith.constant 0 : index
    %3 = vector.load %arg2[%c0_3, %c0_4] : memref<1x8xf32, #tpu.memory_space<vmem>>, vector<1x8xf32>
    %4 = vector.broadcast %3 : vector<1x8xf32> to vector<450x8xf32>
    %5 = arith.addf %2, %4 : vector<450x8xf32>
    %cst_5 = arith.constant 0.000000e+00 : f32
    %6 = vector.broadcast %cst_5 : f32 to vector<450x8xf32>
    %7 = arith.cmpf oge, %5, %6 : vector<450x8xf32>
    %cst_6 = arith.constant 0.00999999977 : f32
    %8 = vector.broadcast %cst_6 : f32 to vector<450x8xf32>
    %9 = arith.mulf %8, %5 : vector<450x8xf32>
    %10 = arith.select %7, %5, %9 : vector<450x8xi1>, vector<450x8xf32>
    %c0_7 = arith.constant 0 : index
    %c0_8 = arith.constant 0 : index
    %11 = vector.load %arg3[%c0_7, %c0_8] : memref<450x8xf32, #tpu.memory_space<vmem>>, vector<450x8xf32>
    tpu.vector_store %arg3[%c0_7, %c0_8], %10 {strides = array<i32>} : memref<450x8xf32, #tpu.memory_space<vmem>>, vector<450x8xf32>,
    return
  }
}

module attributes {stable_mosaic.version = 11 : i64} {
  func.func @_gemm_bias_act_kernel(%arg0: memref<98x72xbf16, #tpu.memory_space<vmem>>, %arg1: memref<72x16xbf16, #tpu.memory_space<vmem>>, %arg2: memref<1x16xf32, #tpu.memory_space<vmem>>, %arg3: memref<98x16xf32, #tpu.memory_space<vmem>>) attributes {dimension_semantics = [], scalar_prefetch = 0 : i64, scratch_operands = 0 : i64, tpu.core_type = #tpu.core_type<tc>} {
    %c0 = arith.constant 0 : index
    %c0_0 = arith.constant 0 : index
    %0 = vector.load %arg0[%c0, %c0_0] : memref<98x72xbf16, #tpu.memory_space<vmem>>, vector<98x72xbf16>
    %c0_1 = arith.constant 0 : index
    %c0_2 = arith.constant 0 : index
    %1 = vector.load %arg1[%c0_1, %c0_2] : memref<72x16xbf16, #tpu.memory_space<vmem>>, vector<72x16xbf16>
    %cst = arith.constant dense<0.000000e+00> : vector<98x16xf32>
    %2 = tpu.matmul %0, %1, %cst {dimension_numbers = #tpu.dot_dimension_numbers<[1], [0], [0], [1], [0, 0, 1, 1], [], []>} : vector<98x72xbf16>, vector<72x16xbf16>, vector<98x16xf32> -> vector<98x16xf32>
    %c0_3 = arith.constant 0 : index
    %c0_4 = arith.constant 0 : index
    %3 = vector.load %arg2[%c0_3, %c0_4] : memref<1x16xf32, #tpu.memory_space<vmem>>, vector<1x16xf32>
    %4 = vector.broadcast %3 : vector<1x16xf32> to vector<98x16xf32>
    %5 = arith.addf %2, %4 : vector<98x16xf32>
    %cst_5 = arith.constant 0.000000e+00 : f32
    %6 = vector.broadcast %cst_5 : f32 to vector<98x16xf32>
    %7 = arith.cmpf oge, %5, %6 : vector<98x16xf32>
    %cst_6 = arith.constant 0.00999999977 : f32
    %8 = vector.broadcast %cst_6 : f32 to vector<98x16xf32>
    %9 = arith.mulf %8, %5 : vector<98x16xf32>
    %10 = arith.select %7, %5, %9 : vector<98x16xi1>, vector<98x16xf32>
    %c0_7 = arith.constant 0 : index
    %c0_8 = arith.constant 0 : index
    %11 = vector.load %arg3[%c0_7, %c0_8] : memref<98x16xf32, #tpu.memory_space<vmem>>, vector<98x16xf32>
    tpu.vector_store %arg3[%c0_7, %c0_8], %10 {strides = array<i32>} : memref<98x16xf32, #tpu.memory_space<vmem>>, vector<98x16xf32>,
    return
  }
}

module attributes {stable_mosaic.version = 11 : i64} {
  func.func @_gemm_bias_act_kernel(%arg0: memref<18x144xbf16, #tpu.memory_space<vmem>>, %arg1: memref<144x32xbf16, #tpu.memory_space<vmem>>, %arg2: memref<1x32xf32, #tpu.memory_space<vmem>>, %arg3: memref<18x32xf32, #tpu.memory_space<vmem>>) attributes {dimension_semantics = [], scalar_prefetch = 0 : i64, scratch_operands = 0 : i64, tpu.core_type = #tpu.core_type<tc>} {
    %c0 = arith.constant 0 : index
    %c0_0 = arith.constant 0 : index
    %0 = vector.load %arg0[%c0, %c0_0] : memref<18x144xbf16, #tpu.memory_space<vmem>>, vector<18x144xbf16>
    %c0_1 = arith.constant 0 : index
    %c0_2 = arith.constant 0 : index
    %1 = vector.load %arg1[%c0_1, %c0_2] : memref<144x32xbf16, #tpu.memory_space<vmem>>, vector<144x32xbf16>
    %cst = arith.constant dense<0.000000e+00> : vector<18x32xf32>
    %2 = tpu.matmul %0, %1, %cst {dimension_numbers = #tpu.dot_dimension_numbers<[1], [0], [0], [1], [0, 0, 1, 1], [], []>} : vector<18x144xbf16>, vector<144x32xbf16>, vector<18x32xf32> -> vector<18x32xf32>
    %c0_3 = arith.constant 0 : index
    %c0_4 = arith.constant 0 : index
    %3 = vector.load %arg2[%c0_3, %c0_4] : memref<1x32xf32, #tpu.memory_space<vmem>>, vector<1x32xf32>
    %4 = vector.broadcast %3 : vector<1x32xf32> to vector<18x32xf32>
    %5 = arith.addf %2, %4 : vector<18x32xf32>
    %cst_5 = arith.constant 0.000000e+00 : f32
    %6 = vector.broadcast %cst_5 : f32 to vector<18x32xf32>
    %7 = arith.cmpf oge, %5, %6 : vector<18x32xf32>
    %cst_6 = arith.constant 0.00999999977 : f32
    %8 = vector.broadcast %cst_6 : f32 to vector<18x32xf32>
    %9 = arith.mulf %8, %5 : vector<18x32xf32>
    %10 = arith.select %7, %5, %9 : vector<18x32xi1>, vector<18x32xf32>
    %c0_7 = arith.constant 0 : index
    %c0_8 = arith.constant 0 : index
    %11 = vector.load %arg3[%c0_7, %c0_8] : memref<18x32xf32, #tpu.memory_space<vmem>>, vector<18x32xf32>
    tpu.vector_store %arg3[%c0_7, %c0_8], %10 {strides = array<i32>} : memref<18x32xf32, #tpu.memory_space<vmem>>, vector<18x32xf32>,
    return
  }
}

module attributes {stable_mosaic.version = 11 : i64} {
  func.func @_gemm_bias_act_kernel(%arg0: memref<2x288xbf16, #tpu.memory_space<vmem>>, %arg1: memref<288x64xbf16, #tpu.memory_space<vmem>>, %arg2: memref<1x64xf32, #tpu.memory_space<vmem>>, %arg3: memref<2x64xf32, #tpu.memory_space<vmem>>) attributes {dimension_semantics = [], scalar_prefetch = 0 : i64, scratch_operands = 0 : i64, tpu.core_type = #tpu.core_type<tc>} {
    %c0 = arith.constant 0 : index
    %c0_0 = arith.constant 0 : index
    %0 = vector.load %arg0[%c0, %c0_0] : memref<2x288xbf16, #tpu.memory_space<vmem>>, vector<2x288xbf16>
    %c0_1 = arith.constant 0 : index
    %c0_2 = arith.constant 0 : index
    %1 = vector.load %arg1[%c0_1, %c0_2] : memref<288x64xbf16, #tpu.memory_space<vmem>>, vector<288x64xbf16>
    %cst = arith.constant dense<0.000000e+00> : vector<2x64xf32>
    %2 = tpu.matmul %0, %1, %cst {dimension_numbers = #tpu.dot_dimension_numbers<[1], [0], [0], [1], [0, 0, 1, 1], [], []>} : vector<2x288xbf16>, vector<288x64xbf16>, vector<2x64xf32> -> vector<2x64xf32>
    %c0_3 = arith.constant 0 : index
    %c0_4 = arith.constant 0 : index
    %3 = vector.load %arg2[%c0_3, %c0_4] : memref<1x64xf32, #tpu.memory_space<vmem>>, vector<1x64xf32>
    %4 = vector.broadcast %3 : vector<1x64xf32> to vector<2x64xf32>
    %5 = arith.addf %2, %4 : vector<2x64xf32>
    %cst_5 = arith.constant 0.000000e+00 : f32
    %6 = vector.broadcast %cst_5 : f32 to vector<2x64xf32>
    %7 = arith.cmpf oge, %5, %6 : vector<2x64xf32>
    %cst_6 = arith.constant 0.00999999977 : f32
    %8 = vector.broadcast %cst_6 : f32 to vector<2x64xf32>
    %9 = arith.mulf %8, %5 : vector<2x64xf32>
    %10 = arith.select %7, %5, %9 : vector<2x64xi1>, vector<2x64xf32>
    %c0_7 = arith.constant 0 : index
    %c0_8 = arith.constant 0 : index
    %11 = vector.load %arg3[%c0_7, %c0_8] : memref<2x64xf32, #tpu.memory_space<vmem>>, vector<2x64xf32>
    tpu.vector_store %arg3[%c0_7, %c0_8], %10 {strides = array<i32>} : memref<2x64xf32, #tpu.memory_space<vmem>>, vector<2x64xf32>,
    return
  }
}

module attributes {stable_mosaic.version = 11 : i64} {
  func.func @_gemm_bias_act_kernel(%arg0: memref<2x64xbf16, #tpu.memory_space<vmem>>, %arg1: memref<64x288xbf16, #tpu.memory_space<vmem>>, %arg2: memref<1x288xf32, #tpu.memory_space<vmem>>, %arg3: memref<2x288xf32, #tpu.memory_space<vmem>>) attributes {dimension_semantics = [], scalar_prefetch = 0 : i64, scratch_operands = 0 : i64, tpu.core_type = #tpu.core_type<tc>} {
    %c0 = arith.constant 0 : index
    %c0_0 = arith.constant 0 : index
    %0 = vector.load %arg0[%c0, %c0_0] : memref<2x64xbf16, #tpu.memory_space<vmem>>, vector<2x64xbf16>
    %c0_1 = arith.constant 0 : index
    %c0_2 = arith.constant 0 : index
    %1 = vector.load %arg1[%c0_1, %c0_2] : memref<64x288xbf16, #tpu.memory_space<vmem>>, vector<64x288xbf16>
    %cst = arith.constant dense<0.000000e+00> : vector<2x288xf32>
    %2 = tpu.matmul %0, %1, %cst {dimension_numbers = #tpu.dot_dimension_numbers<[1], [0], [0], [1], [0, 0, 1, 1], [], []>} : vector<2x64xbf16>, vector<64x288xbf16>, vector<2x288xf32> -> vector<2x288xf32>
    %c0_3 = arith.constant 0 : index
    %c0_4 = arith.constant 0 : index
    %3 = vector.load %arg2[%c0_3, %c0_4] : memref<1x288xf32, #tpu.memory_space<vmem>>, vector<1x288xf32>
    %4 = vector.broadcast %3 : vector<1x288xf32> to vector<2x288xf32>
    %5 = arith.addf %2, %4 : vector<2x288xf32>
    %c0_5 = arith.constant 0 : index
    %c0_6 = arith.constant 0 : index
    %6 = vector.load %arg3[%c0_5, %c0_6] : memref<2x288xf32, #tpu.memory_space<vmem>>, vector<2x288xf32>
    tpu.vector_store %arg3[%c0_5, %c0_6], %5 {strides = array<i32>} : memref<2x288xf32, #tpu.memory_space<vmem>>, vector<2x288xf32>,
    return
  }
}

module attributes {stable_mosaic.version = 11 : i64} {
  func.func @_dense_chain_kernel(%arg0: memref<2x64xf32, #tpu.memory_space<vmem>>, %arg1: memref<2x40xf32, #tpu.memory_space<vmem>>, %arg2: memref<64x32xf32, #tpu.memory_space<vmem>>, %arg3: memref<1x32xf32, #tpu.memory_space<vmem>>, %arg4: memref<32x40xf32, #tpu.memory_space<vmem>>, %arg5: memref<1x40xf32, #tpu.memory_space<vmem>>, %arg6: memref<40x40xf32, #tpu.memory_space<vmem>>, %arg7: memref<1x40xf32, #tpu.memory_space<vmem>>, %arg8: memref<40x40xf32, #tpu.memory_space<vmem>>, %arg9: memref<1x40xf32, #tpu.memory_space<vmem>>, %arg10: memref<40x64xf32, #tpu.memory_space<vmem>>, %arg11: memref<1x64xf32, #tpu.memory_space<vmem>>, %arg12: memref<2x256xf32, #tpu.memory_space<vmem>>) attributes {dimension_semantics = [], scalar_prefetch = 0 : i64, scratch_operands = 0 : i64, tpu.core_type = #tpu.core_type<tc>} {
    %c0 = arith.constant 0 : index
    %c0_0 = arith.constant 0 : index
    %0 = vector.load %arg0[%c0, %c0_0] : memref<2x64xf32, #tpu.memory_space<vmem>>, vector<2x64xf32>
    %c0_1 = arith.constant 0 : index
    %c0_2 = arith.constant 0 : index
    %1 = vector.load %arg2[%c0_1, %c0_2] : memref<64x32xf32, #tpu.memory_space<vmem>>, vector<64x32xf32>
    %cst = arith.constant dense<0.000000e+00> : vector<2x32xf32>
    %2 = tpu.matmul %0, %1, %cst {dimension_numbers = #tpu.dot_dimension_numbers<[1], [0], [0], [1], [0, 0, 1, 1], [], []>} : vector<2x64xf32>, vector<64x32xf32>, vector<2x32xf32> -> vector<2x32xf32>
    %c0_3 = arith.constant 0 : index
    %c0_4 = arith.constant 0 : index
    %3 = vector.load %arg3[%c0_3, %c0_4] : memref<1x32xf32, #tpu.memory_space<vmem>>, vector<1x32xf32>
    %4 = vector.broadcast %3 : vector<1x32xf32> to vector<2x32xf32>
    %5 = arith.addf %2, %4 : vector<2x32xf32>
    %cst_5 = arith.constant 0.000000e+00 : f32
    %6 = vector.broadcast %cst_5 : f32 to vector<2x32xf32>
    %7 = arith.cmpf oge, %5, %6 : vector<2x32xf32>
    %cst_6 = arith.constant 0.00999999977 : f32
    %8 = vector.broadcast %cst_6 : f32 to vector<2x32xf32>
    %9 = arith.mulf %8, %5 : vector<2x32xf32>
    %10 = arith.select %7, %5, %9 : vector<2x32xi1>, vector<2x32xf32>
    %c0_7 = arith.constant 0 : index
    %c0_8 = arith.constant 0 : index
    %11 = vector.load %arg4[%c0_7, %c0_8] : memref<32x40xf32, #tpu.memory_space<vmem>>, vector<32x40xf32>
    %cst_9 = arith.constant dense<0.000000e+00> : vector<2x40xf32>
    %12 = tpu.matmul %10, %11, %cst_9 {dimension_numbers = #tpu.dot_dimension_numbers<[1], [0], [0], [1], [0, 0, 1, 1], [], []>} : vector<2x32xf32>, vector<32x40xf32>, vector<2x40xf32> -> vector<2x40xf32>
    %c0_10 = arith.constant 0 : index
    %c0_11 = arith.constant 0 : index
    %13 = vector.load %arg5[%c0_10, %c0_11] : memref<1x40xf32, #tpu.memory_space<vmem>>, vector<1x40xf32>
    %14 = vector.broadcast %13 : vector<1x40xf32> to vector<2x40xf32>
    %15 = arith.addf %12, %14 : vector<2x40xf32>
    %cst_12 = arith.constant 0.000000e+00 : f32
    %16 = vector.broadcast %cst_12 : f32 to vector<2x40xf32>
    %17 = arith.cmpf oge, %15, %16 : vector<2x40xf32>
    %cst_13 = arith.constant 0.00999999977 : f32
    %18 = vector.broadcast %cst_13 : f32 to vector<2x40xf32>
    %19 = arith.mulf %18, %15 : vector<2x40xf32>
    %20 = arith.select %17, %15, %19 : vector<2x40xi1>, vector<2x40xf32>
    %c0_14 = arith.constant 0 : index
    %c0_15 = arith.constant 0 : index
    %21 = vector.load %arg6[%c0_14, %c0_15] : memref<40x40xf32, #tpu.memory_space<vmem>>, vector<40x40xf32>
    %cst_16 = arith.constant dense<0.000000e+00> : vector<2x40xf32>
    %22 = tpu.matmul %20, %21, %cst_16 {dimension_numbers = #tpu.dot_dimension_numbers<[1], [0], [0], [1], [0, 0, 1, 1], [], []>} : vector<2x40xf32>, vector<40x40xf32>, vector<2x40xf32> -> vector<2x40xf32>
    %c0_17 = arith.constant 0 : index
    %c0_18 = arith.constant 0 : index
    %23 = vector.load %arg7[%c0_17, %c0_18] : memref<1x40xf32, #tpu.memory_space<vmem>>, vector<1x40xf32>
    %24 = vector.broadcast %23 : vector<1x40xf32> to vector<2x40xf32>
    %25 = arith.addf %22, %24 : vector<2x40xf32>
    %c0_19 = arith.constant 0 : index
    %c0_20 = arith.constant 0 : index
    %26 = vector.load %arg8[%c0_19, %c0_20] : memref<40x40xf32, #tpu.memory_space<vmem>>, vector<40x40xf32>
    %cst_21 = arith.constant dense<0.000000e+00> : vector<2x40xf32>
    %27 = tpu.matmul %20, %26, %cst_21 {dimension_numbers = #tpu.dot_dimension_numbers<[1], [0], [0], [1], [0, 0, 1, 1], [], []>} : vector<2x40xf32>, vector<40x40xf32>, vector<2x40xf32> -> vector<2x40xf32>
    %c0_22 = arith.constant 0 : index
    %c0_23 = arith.constant 0 : index
    %28 = vector.load %arg9[%c0_22, %c0_23] : memref<1x40xf32, #tpu.memory_space<vmem>>, vector<1x40xf32>
    %29 = vector.broadcast %28 : vector<1x40xf32> to vector<2x40xf32>
    %30 = arith.addf %27, %29 : vector<2x40xf32>
    %cst_24 = arith.constant 5.000000e-01 : f32
    %31 = vector.broadcast %cst_24 : f32 to vector<2x40xf32>
    %32 = arith.mulf %31, %30 : vector<2x40xf32>
    %33 = math.exp %32 : vector<2x40xf32>
    %c0_25 = arith.constant 0 : index
    %c0_26 = arith.constant 0 : index
    %34 = vector.load %arg1[%c0_25, %c0_26] : memref<2x40xf32, #tpu.memory_space<vmem>>, vector<2x40xf32>
    %35 = arith.mulf %33, %34 : vector<2x40xf32>
    %36 = arith.addf %25, %35 : vector<2x40xf32>
    %c0_27 = arith.constant 0 : index
    %c0_28 = arith.constant 0 : index
    %37 = vector.load %arg10[%c0_27, %c0_28] : memref<40x64xf32, #tpu.memory_space<vmem>>, vector<40x64xf32>
    %cst_29 = arith.constant dense<0.000000e+00> : vector<2x64xf32>
    %38 = tpu.matmul %36, %37, %cst_29 {dimension_numbers = #tpu.dot_dimension_numbers<[1], [0], [0], [1], [0, 0, 1, 1], [], []>} : vector<2x40xf32>, vector<40x64xf32>, vector<2x64xf32> -> vector<2x64xf32>
    %c0_30 = arith.constant 0 : index
    %c0_31 = arith.constant 0 : index
    %39 = vector.load %arg11[%c0_30, %c0_31] : memref<1x64xf32, #tpu.memory_space<vmem>>, vector<1x64xf32>
    %40 = vector.broadcast %39 : vector<1x64xf32> to vector<2x64xf32>
    %41 = arith.addf %38, %40 : vector<2x64xf32>
    %cst_32 = arith.constant 0.000000e+00 : f32
    %42 = vector.broadcast %cst_32 : f32 to vector<2x72xf32>
    %43 = tpu.concatenate %25, %30, %36, %41, %42 in 1 : vector<2x40xf32>, vector<2x40xf32>, vector<2x40xf32>, vector<2x64xf32>, vector<2x72xf32> -> vector<2x256xf32>
    %c0_33 = arith.constant 0 : index
    %c0_34 = arith.constant 0 : index
    %44 = vector.load %arg12[%c0_33, %c0_34] : memref<2x256xf32, #tpu.memory_space<vmem>>, vector<2x256xf32>
    tpu.vector_store %arg12[%c0_33, %c0_34], %43 {strides = array<i32>} : memref<2x256xf32, #tpu.memory_space<vmem>>, vector<2x256xf32>,
    return
  }
}

module attributes {stable_mosaic.version = 11 : i64} {
  func.func @_gemm_bias_act_kernel(%arg0: memref<18x32xbf16, #tpu.memory_space<vmem>>, %arg1: memref<32x144xbf16, #tpu.memory_space<vmem>>, %arg2: memref<1x144xf32, #tpu.memory_space<vmem>>, %arg3: memref<18x144xf32, #tpu.memory_space<vmem>>) attributes {dimension_semantics = [], scalar_prefetch = 0 : i64, scratch_operands = 0 : i64, tpu.core_type = #tpu.core_type<tc>} {
    %c0 = arith.constant 0 : index
    %c0_0 = arith.constant 0 : index
    %0 = vector.load %arg0[%c0, %c0_0] : memref<18x32xbf16, #tpu.memory_space<vmem>>, vector<18x32xbf16>
    %c0_1 = arith.constant 0 : index
    %c0_2 = arith.constant 0 : index
    %1 = vector.load %arg1[%c0_1, %c0_2] : memref<32x144xbf16, #tpu.memory_space<vmem>>, vector<32x144xbf16>
    %cst = arith.constant dense<0.000000e+00> : vector<18x144xf32>
    %2 = tpu.matmul %0, %1, %cst {dimension_numbers = #tpu.dot_dimension_numbers<[1], [0], [0], [1], [0, 0, 1, 1], [], []>} : vector<18x32xbf16>, vector<32x144xbf16>, vector<18x144xf32> -> vector<18x144xf32>
    %c0_3 = arith.constant 0 : index
    %c0_4 = arith.constant 0 : index
    %3 = vector.load %arg2[%c0_3, %c0_4] : memref<1x144xf32, #tpu.memory_space<vmem>>, vector<1x144xf32>
    %4 = vector.broadcast %3 : vector<1x144xf32> to vector<18x144xf32>
    %5 = arith.addf %2, %4 : vector<18x144xf32>
    %c0_5 = arith.constant 0 : index
    %c0_6 = arith.constant 0 : index
    %6 = vector.load %arg3[%c0_5, %c0_6] : memref<18x144xf32, #tpu.memory_space<vmem>>, vector<18x144xf32>
    tpu.vector_store %arg3[%c0_5, %c0_6], %5 {strides = array<i32>} : memref<18x144xf32, #tpu.memory_space<vmem>>, vector<18x144xf32>,
    return
  }
}

module attributes {stable_mosaic.version = 11 : i64} {
  func.func @_gemm_bias_act_kernel(%arg0: memref<98x16xbf16, #tpu.memory_space<vmem>>, %arg1: memref<16x72xbf16, #tpu.memory_space<vmem>>, %arg2: memref<1x72xf32, #tpu.memory_space<vmem>>, %arg3: memref<98x72xf32, #tpu.memory_space<vmem>>) attributes {dimension_semantics = [], scalar_prefetch = 0 : i64, scratch_operands = 0 : i64, tpu.core_type = #tpu.core_type<tc>} {
    %c0 = arith.constant 0 : index
    %c0_0 = arith.constant 0 : index
    %0 = vector.load %arg0[%c0, %c0_0] : memref<98x16xbf16, #tpu.memory_space<vmem>>, vector<98x16xbf16>
    %c0_1 = arith.constant 0 : index
    %c0_2 = arith.constant 0 : index
    %1 = vector.load %arg1[%c0_1, %c0_2] : memref<16x72xbf16, #tpu.memory_space<vmem>>, vector<16x72xbf16>
    %cst = arith.constant dense<0.000000e+00> : vector<98x72xf32>
    %2 = tpu.matmul %0, %1, %cst {dimension_numbers = #tpu.dot_dimension_numbers<[1], [0], [0], [1], [0, 0, 1, 1], [], []>} : vector<98x16xbf16>, vector<16x72xbf16>, vector<98x72xf32> -> vector<98x72xf32>
    %c0_3 = arith.constant 0 : index
    %c0_4 = arith.constant 0 : index
    %3 = vector.load %arg2[%c0_3, %c0_4] : memref<1x72xf32, #tpu.memory_space<vmem>>, vector<1x72xf32>
    %4 = vector.broadcast %3 : vector<1x72xf32> to vector<98x72xf32>
    %5 = arith.addf %2, %4 : vector<98x72xf32>
    %c0_5 = arith.constant 0 : index
    %c0_6 = arith.constant 0 : index
    %6 = vector.load %arg3[%c0_5, %c0_6] : memref<98x72xf32, #tpu.memory_space<vmem>>, vector<98x72xf32>
    tpu.vector_store %arg3[%c0_5, %c0_6], %5 {strides = array<i32>} : memref<98x72xf32, #tpu.memory_space<vmem>>, vector<98x72xf32>,
    return
  }
}

module attributes {stable_mosaic.version = 11 : i64} {
  func.func @_gemm_bias_act_kernel(%arg0: memref<450x8xbf16, #tpu.memory_space<vmem>>, %arg1: memref<8x9xbf16, #tpu.memory_space<vmem>>, %arg2: memref<1x9xf32, #tpu.memory_space<vmem>>, %arg3: memref<450x9xf32, #tpu.memory_space<vmem>>) attributes {dimension_semantics = [], scalar_prefetch = 0 : i64, scratch_operands = 0 : i64, tpu.core_type = #tpu.core_type<tc>} {
    %c0 = arith.constant 0 : index
    %c0_0 = arith.constant 0 : index
    %0 = vector.load %arg0[%c0, %c0_0] : memref<450x8xbf16, #tpu.memory_space<vmem>>, vector<450x8xbf16>
    %c0_1 = arith.constant 0 : index
    %c0_2 = arith.constant 0 : index
    %1 = vector.load %arg1[%c0_1, %c0_2] : memref<8x9xbf16, #tpu.memory_space<vmem>>, vector<8x9xbf16>
    %cst = arith.constant dense<0.000000e+00> : vector<450x9xf32>
    %2 = tpu.matmul %0, %1, %cst {dimension_numbers = #tpu.dot_dimension_numbers<[1], [0], [0], [1], [0, 0, 1, 1], [], []>} : vector<450x8xbf16>, vector<8x9xbf16>, vector<450x9xf32> -> vector<450x9xf32>
    %c0_3 = arith.constant 0 : index
    %c0_4 = arith.constant 0 : index
    %3 = vector.load %arg2[%c0_3, %c0_4] : memref<1x9xf32, #tpu.memory_space<vmem>>, vector<1x9xf32>
    %4 = vector.broadcast %3 : vector<1x9xf32> to vector<450x9xf32>
    %5 = arith.addf %2, %4 : vector<450x9xf32>
    %c0_5 = arith.constant 0 : index
    %c0_6 = arith.constant 0 : index
    %6 = vector.load %arg3[%c0_5, %c0_6] : memref<450x9xf32, #tpu.memory_space<vmem>>, vector<450x9xf32>
    tpu.vector_store %arg3[%c0_5, %c0_6], %5 {strides = array<i32>} : memref<450x9xf32, #tpu.memory_space<vmem>>, vector<450x9xf32>,
    return
  }
}

</mosaic_0001>

<bundles_post_ra>
// kernel: forward.11
= control target key start
LH: loop header
LB: loop body
LE: loop exit
PB: predicated region body
PF: predicated region fallthrough
CT: control target
= control target key end

     0   :  { %vm314_vm0 = vcmask 1043456   ;;  %vm315_vm1 = vcmask 1044480   ;;  %v887_v2 = vmov 65535   ;;  %vm226_vm2 = vcmask 72704   ;;  %s1319_s1 = inlined_call_operand.vmem [shape: bf16[9,8], index: 1, kind: input, shape index: {}]   ;;  %s1320_s0 = inlined_call_operand.vmem [shape: bf16[450,9], index: 0, kind: input, shape index: {}]   ;;  %s1321_s2 = inlined_call_operand.vmem [shape: f32[1,8], index: 2, kind: input, shape index: {}]   ;;  %s1322_s3 = inlined_call_operand.vmem [shape: f32[450,8], index: 3, kind: output, shape index: {}]  }
   0x1   :  { %v822_v0 = vld [vmem:[%s1319_s1] sm:$0xf]  ;;  %v881_v1 = vld [vmem:[%s1319_s1] sm:$0x10]  ;;  %v316_v3 = vsel %vm314_vm0, 4294967295, %v887_v2  ;;  %v854_v11 = vld [vmem:[%s1320_s0 + $0x8] sm:$0xff] }
   0x2   :  { %v823_v4 = vor.u32 %v881_v1, %v822_v0  ;;  %v317_v5 = vsel %vm315_vm1, %v316_v3, 0  ;;  %v853_v7 = vld [vmem:[%s1320_s0] sm:$0xff]  ;;  %v862_v12 = vld [vmem:[%s1320_s0 + $0x48] sm:$0xff]  ;;  %v855_v15 = vld [vmem:[%s1320_s0 + $0x10] sm:$0xff]  ;;  %vm645_vm3 = vcmask 64512  }
   0x3   :  { %v861_v8 = vld [vmem:[%s1320_s0 + $0x40] sm:$0xff]  ;;  %v870_v13 = vld [vmem:[%s1320_s0 + $0x88] sm:$0xff]  ;;  %v863_v16 = vld [vmem:[%s1320_s0 + $0x50] sm:$0xff] }
   0x4   :  { %v319_v6 = vand.u32 %v823_v4, %v317_v5  ;;  %v869_v9 = vld [vmem:[%s1320_s0 + $0x80] sm:$0xff]  ;;  %v878_v14 = vld [vmem:[%s1320_s0 + $0xc8] sm:$0xff]  ;;  %v871_v17 = vld [vmem:[%s1320_s0 + $0x90] sm:$0xff] }
   0x5   :  { %v877_v10 = vld [vmem:[%s1320_s0 + $0xc0] sm:$0xff]  ;;  %v879_v18 = vld [vmem:[%s1320_s0 + $0xd0] sm:$0xff]  ;;  %v856_v19 = vld [vmem:[%s1320_s0 + $0x18] sm:$0xff] }
   0x6   :  { %328 = vmatpush.bf16.msra.mxu0 %v319_v6  ;;  %882 = vmatpush.bf16.msra.mxu1 %v319_v6  ;;  %v864_v20 = vld [vmem:[%s1320_s0 + $0x58] sm:$0xff]  ;;  %v857_v23 = vld [vmem:[%s1320_s0 + $0x20] sm:$0xff]  ;;  %v858_v29 = vld [vmem:[%s1320_s0 + $0x28] sm:$0xff] }
   0x7   :  { %883 = vmatpush.bf16.msra.mxu2 %v319_v6  ;;  %884 = vmatpush.bf16.msra.mxu3 %v319_v6  ;;  %v872_v21 = vld [vmem:[%s1320_s0 + $0x98] sm:$0xff]  ;;  %v865_v24 = vld [vmem:[%s1320_s0 + $0x60] sm:$0xff]  ;;  %v866_v30 = vld [vmem:[%s1320_s0 + $0x68] sm:$0xff] }
   0x8   :  { %v880_v22 = vld [vmem:[%s1320_s0 + $0xd8] sm:$0xff]  ;;  %v873_v25 = vld [vmem:[%s1320_s0 + $0xa0] sm:$0xff]  ;;  %v874_v31 = vld [vmem:[%s1320_s0 + $0xa8] sm:$0xff] }
   0x9   :  { %824 = vmatmul.msk.bf16.vlgmr.msra.gmra.mxu0 %vm226_vm2, %v853_v7  ;;  %832 = vmatmul.msk.bf16.vlgmr.msra.gmra.mxu1 %vm226_vm2, %v861_v8  ;;  %v71_v26 = vld [vmem:[%s1320_s0 + $0xe0] sm:$0x1]  ;;  %v859_v32 = vld [vmem:[%s1320_s0 + $0x30] sm:$0xff]  ;;  %v860_v35 = vld [vmem:[%s1320_s0 + $0x38] sm:$0xff] }
   0xa   :  { %840 = vmatmul.msk.bf16.vlgmr.msra.gmra.mxu2 %vm226_vm2, %v869_v9  ;;  %848 = vmatmul.msk.bf16.vlgmr.msra.gmra.mxu3 %vm226_vm2, %v877_v10  ;;  %v191_v27 = vunpack.c.l.b16 %v71_v26  ;;  %v867_v33 = vld [vmem:[%s1320_s0 + $0x70] sm:$0xff]  ;;  %v868_v36 = vld [vmem:[%s1320_s0 + $0x78] sm:$0xff]  ;;  %v1033_v38 = vld [vmem:[%s1321_s2] ss:$0 sm:$0xff] }
   0xb   :  { %v875_v34 = vld [vmem:[%s1320_s0 + $0xb0] sm:$0xff]  ;;  %v876_v37 = vld [vmem:[%s1320_s0 + $0xb8] sm:$0xff] }
   0xc   :  { %v220_v28 = vpack.c.b16 %v191_v27, %v191_v27 }
  0x19   :  { %825 = vmatmul.msk.bf16.gmra.mxu0 %vm226_vm2, %v854_v11  ;;  %833 = vmatmul.msk.bf16.gmra.mxu1 %vm226_vm2, %v862_v12 }
  0x1a   :  { %841 = vmatmul.msk.bf16.gmra.mxu2 %vm226_vm2, %v870_v13  ;;  %849 = vmatmul.msk.bf16.gmra.mxu3 %vm226_vm2, %v878_v14 }
  0x29   :  { %826 = vmatmul.msk.bf16.gmra.mxu0 %vm226_vm2, %v855_v15  ;;  %834 = vmatmul.msk.bf16.gmra.mxu1 %vm226_vm2, %v863_v16 }
  0x2a   :  { %842 = vmatmul.msk.bf16.gmra.mxu2 %vm226_vm2, %v871_v17  ;;  %850 = vmatmul.msk.bf16.gmra.mxu3 %vm226_vm2, %v879_v18 }
  0x39   :  { %827 = vmatmul.msk.bf16.gmra.mxu0 %vm226_vm2, %v856_v19  ;;  %835 = vmatmul.msk.bf16.gmra.mxu1 %vm226_vm2, %v864_v20 }
  0x3a   :  { %843 = vmatmul.msk.bf16.gmra.mxu2 %vm226_vm2, %v872_v21  ;;  %851 = vmatmul.msk.bf16.gmra.mxu3 %vm226_vm2, %v880_v22 }
  0x49   :  { %828 = vmatmul.msk.bf16.gmra.mxu0 %vm226_vm2, %v857_v23  ;;  %836 = vmatmul.msk.bf16.gmra.mxu1 %vm226_vm2, %v865_v24 }
  0x4a   :  { %844 = vmatmul.msk.bf16.gmra.mxu2 %vm226_vm2, %v873_v25  ;;  %852 = vmatmul.msk.bf16.gmra.mxu3 %vm226_vm2, %v220_v28 }
  0x59   :  { %829 = vmatmul.msk.bf16.gmra.mxu0 %vm226_vm2, %v858_v29  ;;  %837 = vmatmul.msk.bf16.gmra.mxu1 %vm226_vm2, %v866_v30 }
  0x5a   :  { %845 = vmatmul.msk.bf16.gmra.mxu2 %vm226_vm2, %v874_v31 }
  0x69   :  { %830 = vmatmul.msk.bf16.gmra.mxu0 %vm226_vm2, %v859_v32  ;;  %838 = vmatmul.msk.bf16.gmra.mxu1 %vm226_vm2, %v867_v33 }
  0x6a   :  { %846 = vmatmul.msk.bf16.gmra.mxu2 %vm226_vm2, %v875_v34 }
  0x79   :  { %831 = vmatmul.msk.bf16.gmra.mxu0 %vm226_vm2, %v860_v35  ;;  %839 = vmatmul.msk.bf16.gmra.mxu1 %vm226_vm2, %v868_v36 }
  0x7a   :  { %847 = vmatmul.msk.bf16.gmra.mxu2 %vm226_vm2, %v876_v37 }
  0x86   :  { %v330_v39 = vpop.f32.mrf.mxu0  ;;  %v370_v40 = vpop.f32.mrf.mxu1 }
  0x87   :  { %v331_v41 = vadd.f32 %v1033_v38, %v330_v39  ;;  %v371_v42 = vadd.f32 %v1033_v38, %v370_v40 }
  0x89   :  { %vm474_vm4 = vcmp.ge.f32.partialorder %v331_v41, 0.0  ;;  %v531_v43 = vmul.f32 0.01, %v331_v41  ;;  %vm490_vm5 = vcmp.ge.f32.partialorder %v371_v42, 0.0  ;;  %v547_v44 = vmul.f32 0.01, %v371_v42 }
  0x8b   :  { %v588_v45 = vsel %vm474_vm4, %v331_v41, %v531_v43  ;;  %v604_v46 = vsel %vm490_vm5, %v371_v42, %v547_v44 }
  0x8c   :  { %646 = vst.msk [vmem:[%s1322_s3] sm:$0xff] %vm645_vm3, %v588_v45 }
  0x8d   :  { %662 = vst.msk [vmem:[%s1322_s3 + $0x80] sm:$0xff] %vm645_vm3, %v604_v46  ;;  %v410_v47 = vpop.f32.mrf.mxu2  ;;  %v450_v4 = vpop.f32.mrf.mxu3 }
  0x8e   :  { %v411_v48 = vadd.f32 %v1033_v38, %v410_v47  ;;  %v332_v49 = vpop.f32.mrf.mxu0  ;;  %v372_v50 = vpop.f32.mrf.mxu1  ;;  %v451_v9 = vadd.f32 %v1033_v38, %v450_v4 }
  0x8f   :  { %v333_v51 = vadd.f32 %v1033_v38, %v332_v49  ;;  %v373_v52 = vadd.f32 %v1033_v38, %v372_v50 }
  0x90   :  { %vm506_vm6 = vcmp.ge.f32.partialorder %v411_v48, 0.0  ;;  %v563_v53 = vmul.f32 0.01, %v411_v48  ;;  %v579_v15 = vmul.f32 0.01, %v451_v9  ;;  %vm522_vm13 = vcmp.ge.f32.partialorder %v451_v9, 0.0 }
  0x91   :  { %vm475_vm7 = vcmp.ge.f32.partialorder %v333_v51, 0.0  ;;  %v532_v54 = vmul.f32 0.01, %v333_v51  ;;  %vm491_vm8 = vcmp.ge.f32.partialorder %v373_v52, 0.0  ;;  %v548_v55 = vmul.f32 0.01, %v373_v52 }
  0x92   :  { %v620_v56 = vsel %vm506_vm6, %v411_v48, %v563_v53  ;;  %v636_v24 = vsel %vm522_vm13, %v451_v9, %v579_v15 }
  0x93   :  { %678 = vst.msk [vmem:[%s1322_s3 + $0x100] sm:$0xff] %vm645_vm3, %v620_v56  ;;  %v589_v57 = vsel %vm475_vm7, %v333_v51, %v532_v54  ;;  %v605_v58 = vsel %vm491_vm8, %v373_v52, %v548_v55 }
  0x94   :  { %647 = vst.msk [vmem:[%s1322_s3 + $0x8] sm:$0xff] %vm645_vm3, %v589_v57 }
  0x95   :  { %663 = vst.msk [vmem:[%s1322_s3 + $0x88] sm:$0xff] %vm645_vm3, %v605_v58  ;;  %v412_v59 = vpop.f32.mrf.mxu2  ;;  %v452_v19 = vpop.f32.mrf.mxu3 }
  0x96   :  { %v413_v60 = vadd.f32 %v1033_v38, %v412_v59  ;;  %v335_v61 = vpop.f32.mrf.mxu0  ;;  %v375_v62 = vpop.f32.mrf.mxu1  ;;  %v453_v21 = vadd.f32 %v1033_v38, %v452_v19  ;;  %694 = vst.msk [vmem:[%s1322_s3 + $0x180] sm:$0xff] %vm645_vm3, %v636_v24 }
  0x97   :  { %v336_v63 = vadd.f32 %v1033_v38, %v335_v61  ;;  %v376_v0 = vadd.f32 %v1033_v38, %v375_v62 }
  0x98   :  { %vm507_vm9 = vcmp.ge.f32.partialorder %v413_v60, 0.0  ;;  %v564_v1 = vmul.f32 0.01, %v413_v60  ;;  %v580_v25 = vmul.f32 0.01, %v453_v21  ;;  %vm523_vm0 = vcmp.ge.f32.partialorder %v453_v21, 0.0 }
  0x99   :  { %vm476_vm10 = vcmp.ge.f32.partialorder %v336_v63, 0.0  ;;  %v533_v2 = vmul.f32 0.01, %v336_v63  ;;  %vm492_vm11 = vcmp.ge.f32.partialorder %v376_v0, 0.0  ;;  %v549_v3 = vmul.f32 0.01, %v376_v0 }
  0x9a   :  { %v621_v5 = vsel %vm507_vm9, %v413_v60, %v564_v1  ;;  %v637_v30 = vsel %vm523_vm0, %v453_v21, %v580_v25 }
  0x9b   :  { %679 = vst.msk [vmem:[%s1322_s3 + $0x108] sm:$0xff] %vm645_vm3, %v621_v5  ;;  %v590_v6 = vsel %vm476_vm10, %v336_v63, %v533_v2  ;;  %v606_v7 = vsel %vm492_vm11, %v376_v0, %v549_v3 }
  0x9c   :  { %648 = vst.msk [vmem:[%s1322_s3 + $0x10] sm:$0xff] %vm645_vm3, %v590_v6 }
  0x9d   :  { %664 = vst.msk [vmem:[%s1322_s3 + $0x90] sm:$0xff] %vm645_vm3, %v606_v7  ;;  %v415_v8 = vpop.f32.mrf.mxu2  ;;  %v455_v36 = vpop.f32.mrf.mxu3 }
  0x9e   :  { %v416_v10 = vadd.f32 %v1033_v38, %v415_v8  ;;  %v337_v11 = vpop.f32.mrf.mxu0  ;;  %v377_v12 = vpop.f32.mrf.mxu1  ;;  %695 = vst.msk [vmem:[%s1322_s3 + $0x188] sm:$0xff] %vm645_vm3, %v637_v30  ;;  %v456_v42 = vadd.f32 %v1033_v38, %v455_v36 }
  0x9f   :  { %v338_v13 = vadd.f32 %v1033_v38, %v337_v11  ;;  %v378_v14 = vadd.f32 %v1033_v38, %v377_v12 }
  0xa0   :  { %vm508_vm12 = vcmp.ge.f32.partialorder %v416_v10, 0.0  ;;  %v565_v16 = vmul.f32 0.01, %v416_v10  ;;  %v581_v48 = vmul.f32 0.01, %v456_v42  ;;  %vm524_vm6 = vcmp.ge.f32.partialorder %v456_v42, 0.0 }
  0xa1   :  { %vm477_vm14 = vcmp.ge.f32.partialorder %v338_v13, 0.0  ;;  %v534_v17 = vmul.f32 0.01, %v338_v13  ;;  %vm493_vm15 = vcmp.ge.f32.partialorder %v378_v14, 0.0  ;;  %v550_v18 = vmul.f32 0.01, %v378_v14 }
  0xa2   :  { %v622_v20 = vsel %vm508_vm12, %v416_v10, %v565_v16  ;;  %v638_v57 = vsel %vm524_vm6, %v456_v42, %v581_v48 }
  0xa3   :  { %680 = vst.msk [vmem:[%s1322_s3 + $0x110] sm:$0xff] %vm645_vm3, %v622_v20  ;;  %v591_v22 = vsel %vm477_vm14, %v338_v13, %v534_v17  ;;  %v607_v23 = vsel %vm493_vm15, %v378_v14, %v550_v18 }
  0xa4   :  { %649 = vst.msk [vmem:[%s1322_s3 + $0x18] sm:$0xff] %vm645_vm3, %v591_v22 }
  0xa5   :  { %665 = vst.msk [vmem:[%s1322_s3 + $0x98] sm:$0xff] %vm645_vm3, %v607_v23  ;;  %v417_v26 = vpop.f32.mrf.mxu2  ;;  %v457_v52 = vpop.f32.mrf.mxu3 }
  0xa6   :  { %v418_v27 = vadd.f32 %v1033_v38, %v417_v26  ;;  %v340_v28 = vpop.f32.mrf.mxu0  ;;  %v380_v29 = vpop.f32.mrf.mxu1  ;;  %v458_v54 = vadd.f32 %v1033_v38, %v457_v52  ;;  %696 = vst.msk [vmem:[%s1322_s3 + $0x190] sm:$0xff] %vm645_vm3, %v638_v57 }
  0xa7   :  { %v341_v31 = vadd.f32 %v1033_v38, %v340_v28  ;;  %v381_v32 = vadd.f32 %v1033_v38, %v380_v29 }
  0xa8   :  { %vm509_vm1 = vcmp.ge.f32.partialorder %v418_v27, 0.0  ;;  %v566_v33 = vmul.f32 0.01, %v418_v27  ;;  %v582_v58 = vmul.f32 0.01, %v458_v54  ;;  %vm525_vm9 = vcmp.ge.f32.partialorder %v458_v54, 0.0 }
  0xa9   :  { %vm478_vm2 = vcmp.ge.f32.partialorder %v341_v31, 0.0  ;;  %v535_v34 = vmul.f32 0.01, %v341_v31  ;;  %vm494_vm4 = vcmp.ge.f32.partialorder %v381_v32, 0.0  ;;  %v551_v35 = vmul.f32 0.01, %v381_v32 }
  0xaa   :  { %v623_v37 = vsel %vm509_vm1, %v418_v27, %v566_v33  ;;  %v639_v63 = vsel %vm525_vm9, %v458_v54, %v582_v58 }
  0xab   :  { %681 = vst.msk [vmem:[%s1322_s3 + $0x118] sm:$0xff] %vm645_vm3, %v623_v37  ;;  %v592_v39 = vsel %vm478_vm2, %v341_v31, %v535_v34  ;;  %v608_v40 = vsel %vm494_vm4, %v381_v32, %v551_v35 }
  0xac   :  { %650 = vst.msk [vmem:[%s1322_s3 + $0x20] sm:$0xff] %vm645_vm3, %v592_v39 }
  0xad   :  { %666 = vst.msk [vmem:[%s1322_s3 + $0xa0] sm:$0xff] %vm645_vm3, %v608_v40  ;;  %v420_v41 = vpop.f32.mrf.mxu2  ;;  %v460_v5 = vpop.f32.mrf.mxu3 }
  0xae   :  { %v421_v43 = vadd.f32 %v1033_v38, %v420_v41  ;;  %v342_v44 = vpop.f32.mrf.mxu0  ;;  %v382_v45 = vpop.f32.mrf.mxu1  ;;  %697 = vst.msk [vmem:[%s1322_s3 + $0x198] sm:$0xff] %vm645_vm3, %v639_v63  ;;  %v461_v10 = vadd.f32 %v1033_v38, %v460_v5 }
  0xaf   :  { %v343_v46 = vadd.f32 %v1033_v38, %v342_v44  ;;  %v383_v47 = vadd.f32 %v1033_v38, %v382_v45 }
  0xb0   :  { %vm510_vm5 = vcmp.ge.f32.partialorder %v421_v43, 0.0  ;;  %v567_v49 = vmul.f32 0.01, %v421_v43  ;;  %v583_v16 = vmul.f32 0.01, %v461_v10  ;;  %vm526_vm14 = vcmp.ge.f32.partialorder %v461_v10, 0.0 }
  0xb1   :  { %vm479_vm7 = vcmp.ge.f32.partialorder %v343_v46, 0.0  ;;  %v536_v50 = vmul.f32 0.01, %v343_v46  ;;  %vm495_vm8 = vcmp.ge.f32.partialorder %v383_v47, 0.0  ;;  %v552_v51 = vmul.f32 0.01, %v383_v47 }
  0xb2   :  { %v624_v53 = vsel %vm510_vm5, %v421_v43, %v567_v49  ;;  %v640_v25 = vsel %vm526_vm14, %v461_v10, %v583_v16 }
  0xb3   :  { %682 = vst.msk [vmem:[%s1322_s3 + $0x120] sm:$0xff] %vm645_vm3, %v624_v53  ;;  %v593_v55 = vsel %vm479_vm7, %v343_v46, %v536_v50  ;;  %v609_v56 = vsel %vm495_vm8, %v383_v47, %v552_v51 }
  0xb4   :  { %651 = vst.msk [vmem:[%s1322_s3 + $0x28] sm:$0xff] %vm645_vm3, %v593_v55 }
  0xb5   :  { %667 = vst.msk [vmem:[%s1322_s3 + $0xa8] sm:$0xff] %vm645_vm3, %v609_v56  ;;  %v422_v59 = vpop.f32.mrf.mxu2  ;;  %v462_v20 = vpop.f32.mrf.mxu3 }
  0xb6   :  { %v423_v60 = vadd.f32 %v1033_v38, %v422_v59  ;;  %v345_v61 = vpop.f32.mrf.mxu0  ;;  %v385_v62 = vpop.f32.mrf.mxu1  ;;  %v463_v22 = vadd.f32 %v1033_v38, %v462_v20  ;;  %698 = vst.msk [vmem:[%s1322_s3 + $0x1a0] sm:$0xff] %vm645_vm3, %v640_v25 }
  0xb7   :  { %v346_v0 = vadd.f32 %v1033_v38, %v345_v61  ;;  %v386_v1 = vadd.f32 %v1033_v38, %v385_v62 }
  0xb8   :  { %vm511_vm10 = vcmp.ge.f32.partialorder %v423_v60, 0.0  ;;  %v568_v2 = vmul.f32 0.01, %v423_v60  ;;  %v584_v26 = vmul.f32 0.01, %v463_v22  ;;  %vm527_vm1 = vcmp.ge.f32.partialorder %v463_v22, 0.0 }
  0xb9   :  { %vm480_vm11 = vcmp.ge.f32.partialorder %v346_v0, 0.0  ;;  %v537_v3 = vmul.f32 0.01, %v346_v0  ;;  %vm496_vm12 = vcmp.ge.f32.partialorder %v386_v1, 0.0  ;;  %v553_v4 = vmul.f32 0.01, %v386_v1 }
  0xba   :  { %v625_v6 = vsel %vm511_vm10, %v423_v60, %v568_v2  ;;  %v641_v31 = vsel %vm527_vm1, %v463_v22, %v584_v26 }
  0xbb   :  { %683 = vst.msk [vmem:[%s1322_s3 + $0x128] sm:$0xff] %vm645_vm3, %v625_v6  ;;  %v594_v7 = vsel %vm480_vm11, %v346_v0, %v537_v3  ;;  %v610_v8 = vsel %vm496_vm12, %v386_v1, %v553_v4 }
  0xbc   :  { %652 = vst.msk [vmem:[%s1322_s3 + $0x30] sm:$0xff] %vm645_vm3, %v594_v7 }
  0xbd   :  { %668 = vst.msk [vmem:[%s1322_s3 + $0xb0] sm:$0xff] %vm645_vm3, %v610_v8  ;;  %v425_v9 = vpop.f32.mrf.mxu2  ;;  %v465_v37 = vpop.f32.mrf.mxu3 }
  0xbe   :  { %v426_v11 = vadd.f32 %v1033_v38, %v425_v9  ;;  %v347_v12 = vpop.f32.mrf.mxu0  ;;  %v387_v13 = vpop.f32.mrf.mxu1  ;;  %699 = vst.msk [vmem:[%s1322_s3 + $0x1a8] sm:$0xff] %vm645_vm3, %v641_v31  ;;  %v466_v43 = vadd.f32 %v1033_v38, %v465_v37 }
  0xbf   :  { %v348_v14 = vadd.f32 %v1033_v38, %v347_v12  ;;  %v388_v15 = vadd.f32 %v1033_v38, %v387_v13 }
  0xc0   :  { %vm512_vm13 = vcmp.ge.f32.partialorder %v426_v11, 0.0  ;;  %v569_v17 = vmul.f32 0.01, %v426_v11  ;;  %v585_v49 = vmul.f32 0.01, %v466_v43  ;;  %vm528_vm7 = vcmp.ge.f32.partialorder %v466_v43, 0.0 }
  0xc1   :  { %vm481_vm15 = vcmp.ge.f32.partialorder %v348_v14, 0.0  ;;  %v538_v18 = vmul.f32 0.01, %v348_v14  ;;  %vm497_vm0 = vcmp.ge.f32.partialorder %v388_v15, 0.0  ;;  %v554_v19 = vmul.f32 0.01, %v388_v15 }
  0xc2   :  { %v626_v21 = vsel %vm512_vm13, %v426_v11, %v569_v17  ;;  %v642_v58 = vsel %vm528_vm7, %v466_v43, %v585_v49 }
  0xc3   :  { %684 = vst.msk [vmem:[%s1322_s3 + $0x130] sm:$0xff] %vm645_vm3, %v626_v21  ;;  %v595_v23 = vsel %vm481_vm15, %v348_v14, %v538_v18  ;;  %v611_v24 = vsel %vm497_vm0, %v388_v15, %v554_v19 }
  0xc4   :  { %653 = vst.msk [vmem:[%s1322_s3 + $0x38] sm:$0xff] %vm645_vm3, %v595_v23 }
  0xc5   :  { %669 = vst.msk [vmem:[%s1322_s3 + $0xb8] sm:$0xff] %vm645_vm3, %v611_v24  ;;  %v427_v27 = vpop.f32.mrf.mxu2  ;;  %v467_v53 = vpop.f32.mrf.mxu3 }
  0xc6   :  { %v428_v28 = vadd.f32 %v1033_v38, %v427_v27  ;;  %v350_v29 = vpop.f32.mrf.mxu0  ;;  %v390_v30 = vpop.f32.mrf.mxu1  ;;  %v468_v55 = vadd.f32 %v1033_v38, %v467_v53  ;;  %700 = vst.msk [vmem:[%s1322_s3 + $0x1b0] sm:$0xff] %vm645_vm3, %v642_v58 }
  0xc7   :  { %v351_v32 = vadd.f32 %v1033_v38, %v350_v29  ;;  %v391_v33 = vadd.f32 %v1033_v38, %v390_v30 }
  0xc8   :  { %vm513_vm2 = vcmp.ge.f32.partialorder %v428_v28, 0.0  ;;  %v570_v34 = vmul.f32 0.01, %v428_v28  ;;  %v586_v59 = vmul.f32 0.01, %v468_v55  ;;  %vm529_vm10 = vcmp.ge.f32.partialorder %v468_v55, 0.0 }
  0xc9   :  { %vm482_vm4 = vcmp.ge.f32.partialorder %v351_v32, 0.0  ;;  %v539_v35 = vmul.f32 0.01, %v351_v32  ;;  %vm498_vm5 = vcmp.ge.f32.partialorder %v391_v33, 0.0  ;;  %v555_v36 = vmul.f32 0.01, %v391_v33 }
  0xca   :  { %v627_v39 = vsel %vm513_vm2, %v428_v28, %v570_v34  ;;  %v643_v0 = vsel %vm529_vm10, %v468_v55, %v586_v59  ;;  %vm702_vm2 = vcmask 58368  }
  0xcb   :  { %685 = vst.msk [vmem:[%s1322_s3 + $0x138] sm:$0xff] %vm645_vm3, %v627_v39  ;;  %v596_v40 = vsel %vm482_vm4, %v351_v32, %v539_v35  ;;  %v612_v41 = vsel %vm498_vm5, %v391_v33, %v555_v36 }
  0xcc   :  { %654 = vst.msk [vmem:[%s1322_s3 + $0x40] sm:$0xff] %vm645_vm3, %v596_v40 }
  0xcd   :  { %670 = vst.msk [vmem:[%s1322_s3 + $0xc0] sm:$0xff] %vm645_vm3, %v612_v41  ;;  %v430_v42 = vpop.f32.mrf.mxu2  ;;  %v470_v9 = vpop.f32.mrf.mxu3 }
  0xce   :  { %v431_v44 = vadd.f32 %v1033_v38, %v430_v42  ;;  %v352_v45 = vpop.f32.mrf.mxu0  ;;  %v392_v46 = vpop.f32.mrf.mxu1  ;;  %701 = vst.msk [vmem:[%s1322_s3 + $0x1b8] sm:$0xff] %vm645_vm3, %v643_v0  ;;  %v471_v11 = vadd.f32 %v1033_v38, %v470_v9 }
  0xcf   :  { %v353_v47 = vadd.f32 %v1033_v38, %v352_v45  ;;  %v393_v48 = vadd.f32 %v1033_v38, %v392_v46 }
  0xd0   :  { %vm514_vm6 = vcmp.ge.f32.partialorder %v431_v44, 0.0  ;;  %v571_v50 = vmul.f32 0.01, %v431_v44  ;;  %v587_v17 = vmul.f32 0.01, %v471_v11  ;;  %vm530_vm15 = vcmp.ge.f32.partialorder %v471_v11, 0.0 }
  0xd1   :  { %vm483_vm8 = vcmp.ge.f32.partialorder %v353_v47, 0.0  ;;  %v540_v51 = vmul.f32 0.01, %v353_v47  ;;  %vm499_vm9 = vcmp.ge.f32.partialorder %v393_v48, 0.0  ;;  %v556_v52 = vmul.f32 0.01, %v393_v48 }
  0xd2   :  { %v628_v54 = vsel %vm514_vm6, %v431_v44, %v571_v50  ;;  %v644_v24 = vsel %vm530_vm15, %v471_v11, %v587_v17 }
  0xd3   :  { %686 = vst.msk [vmem:[%s1322_s3 + $0x140] sm:$0xff] %vm645_vm3, %v628_v54  ;;  %v597_v56 = vsel %vm483_vm8, %v353_v47, %v540_v51  ;;  %v613_v57 = vsel %vm499_vm9, %v393_v48, %v556_v52 }
  0xd4   :  { %655 = vst.msk [vmem:[%s1322_s3 + $0x48] sm:$0xff] %vm645_vm3, %v597_v56 }
  0xd5   :  { %671 = vst.msk [vmem:[%s1322_s3 + $0xc8] sm:$0xff] %vm645_vm3, %v613_v57  ;;  %v432_v60 = vpop.f32.mrf.mxu2  ;;  %v472_v25 = vpop.f32.mrf.mxu3 }
  0xd6   :  { %v433_v61 = vadd.f32 %v1033_v38, %v432_v60  ;;  %v355_v62 = vpop.f32.mrf.mxu0  ;;  %v395_v63 = vpop.f32.mrf.mxu1  ;;  %703 = vst.msk [vmem:[%s1322_s3 + $0x1c0] sm:$0x3] %vm702_vm2, %v644_v24 }
  0xd7   :  { %v356_v1 = vadd.f32 %v1033_v38, %v355_v62  ;;  %v396_v2 = vadd.f32 %v1033_v38, %v395_v63 }
  0xd8   :  { %vm515_vm11 = vcmp.ge.f32.partialorder %v433_v61, 0.0  ;;  %v572_v3 = vmul.f32 0.01, %v433_v61 }
  0xd9   :  { %vm484_vm12 = vcmp.ge.f32.partialorder %v356_v1, 0.0  ;;  %v541_v4 = vmul.f32 0.01, %v356_v1  ;;  %vm500_vm13 = vcmp.ge.f32.partialorder %v396_v2, 0.0  ;;  %v557_v5 = vmul.f32 0.01, %v396_v2 }
  0xda   :  { %v629_v6 = vsel %vm515_vm11, %v433_v61, %v572_v3 }
  0xdb   :  { %687 = vst.msk [vmem:[%s1322_s3 + $0x148] sm:$0xff] %vm645_vm3, %v629_v6  ;;  %v598_v7 = vsel %vm484_vm12, %v356_v1, %v541_v4  ;;  %v614_v8 = vsel %vm500_vm13, %v396_v2, %v557_v5 }
  0xdc   :  { %656 = vst.msk [vmem:[%s1322_s3 + $0x50] sm:$0xff] %vm645_vm3, %v598_v7 }
  0xdd   :  { %672 = vst.msk [vmem:[%s1322_s3 + $0xd0] sm:$0xff] %vm645_vm3, %v614_v8  ;;  %v435_v10 = vpop.f32.mrf.mxu2 }
  0xde   :  { %v436_v12 = vadd.f32 %v1033_v38, %v435_v10  ;;  %v357_v13 = vpop.f32.mrf.mxu0  ;;  %v397_v14 = vpop.f32.mrf.mxu1 }
  0xdf   :  { %v358_v15 = vadd.f32 %v1033_v38, %v357_v13  ;;  %v398_v16 = vadd.f32 %v1033_v38, %v397_v14 }
  0xe0   :  { %vm516_vm14 = vcmp.ge.f32.partialorder %v436_v12, 0.0  ;;  %v573_v18 = vmul.f32 0.01, %v436_v12 }
  0xe1   :  { %vm485_vm0 = vcmp.ge.f32.partialorder %v358_v15, 0.0  ;;  %v542_v19 = vmul.f32 0.01, %v358_v15  ;;  %vm501_vm1 = vcmp.ge.f32.partialorder %v398_v16, 0.0  ;;  %v558_v20 = vmul.f32 0.01, %v398_v16 }
  0xe2   :  { %v630_v21 = vsel %vm516_vm14, %v436_v12, %v573_v18 }
  0xe3   :  { %688 = vst.msk [vmem:[%s1322_s3 + $0x150] sm:$0xff] %vm645_vm3, %v630_v21  ;;  %v599_v22 = vsel %vm485_vm0, %v358_v15, %v542_v19  ;;  %v615_v23 = vsel %vm501_vm1, %v398_v16, %v558_v20 }
  0xe4   :  { %657 = vst.msk [vmem:[%s1322_s3 + $0x58] sm:$0xff] %vm645_vm3, %v599_v22 }
  0xe5   :  { %673 = vst.msk [vmem:[%s1322_s3 + $0xd8] sm:$0xff] %vm645_vm3, %v615_v23  ;;  %v437_v26 = vpop.f32.mrf.mxu2 }
  0xe6   :  { %v438_v27 = vadd.f32 %v1033_v38, %v437_v26  ;;  %v360_v28 = vpop.f32.mrf.mxu0  ;;  %v400_v29 = vpop.f32.mrf.mxu1 }
  0xe7   :  { %v361_v30 = vadd.f32 %v1033_v38, %v360_v28  ;;  %v401_v31 = vadd.f32 %v1033_v38, %v400_v29 }
  0xe8   :  { %vm517_vm4 = vcmp.ge.f32.partialorder %v438_v27, 0.0  ;;  %v574_v32 = vmul.f32 0.01, %v438_v27 }
  0xe9   :  { %vm486_vm5 = vcmp.ge.f32.partialorder %v361_v30, 0.0  ;;  %v543_v33 = vmul.f32 0.01, %v361_v30  ;;  %vm502_vm6 = vcmp.ge.f32.partialorder %v401_v31, 0.0  ;;  %v559_v34 = vmul.f32 0.01, %v401_v31 }
  0xea   :  { %v631_v35 = vsel %vm517_vm4, %v438_v27, %v574_v32 }
  0xeb   :  { %689 = vst.msk [vmem:[%s1322_s3 + $0x158] sm:$0xff] %vm645_vm3, %v631_v35  ;;  %v600_v36 = vsel %vm486_vm5, %v361_v30, %v543_v33  ;;  %v616_v37 = vsel %vm502_vm6, %v401_v31, %v559_v34 }
  0xec   :  { %658 = vst.msk [vmem:[%s1322_s3 + $0x60] sm:$0xff] %vm645_vm3, %v600_v36 }
  0xed   :  { %674 = vst.msk [vmem:[%s1322_s3 + $0xe0] sm:$0xff] %vm645_vm3, %v616_v37  ;;  %v440_v39 = vpop.f32.mrf.mxu2 }
  0xee   :  { %v441_v40 = vadd.f32 %v1033_v38, %v440_v39  ;;  %v362_v41 = vpop.f32.mrf.mxu0  ;;  %v402_v42 = vpop.f32.mrf.mxu1 }
  0xef   :  { %v363_v43 = vadd.f32 %v1033_v38, %v362_v41  ;;  %v403_v44 = vadd.f32 %v1033_v38, %v402_v42 }
  0xf0   :  { %vm518_vm7 = vcmp.ge.f32.partialorder %v441_v40, 0.0  ;;  %v575_v45 = vmul.f32 0.01, %v441_v40 }
  0xf1   :  { %vm487_vm8 = vcmp.ge.f32.partialorder %v363_v43, 0.0  ;;  %v544_v46 = vmul.f32 0.01, %v363_v43  ;;  %vm503_vm9 = vcmp.ge.f32.partialorder %v403_v44, 0.0  ;;  %v560_v47 = vmul.f32 0.01, %v403_v44 }
  0xf2   :  { %v632_v48 = vsel %vm518_vm7, %v441_v40, %v575_v45 }
  0xf3   :  { %690 = vst.msk [vmem:[%s1322_s3 + $0x160] sm:$0xff] %vm645_vm3, %v632_v48  ;;  %v601_v49 = vsel %vm487_vm8, %v363_v43, %v544_v46  ;;  %v617_v50 = vsel %vm503_vm9, %v403_v44, %v560_v47 }
  0xf4   :  { %659 = vst.msk [vmem:[%s1322_s3 + $0x68] sm:$0xff] %vm645_vm3, %v601_v49 }
  0xf5   :  { %675 = vst.msk [vmem:[%s1322_s3 + $0xe8] sm:$0xff] %vm645_vm3, %v617_v50  ;;  %v442_v51 = vpop.f32.mrf.mxu2 }
  0xf6   :  { %v443_v52 = vadd.f32 %v1033_v38, %v442_v51  ;;  %v365_v53 = vpop.f32.mrf.mxu0  ;;  %v405_v54 = vpop.f32.mrf.mxu1 }
  0xf7   :  { %v366_v55 = vadd.f32 %v1033_v38, %v365_v53  ;;  %v406_v56 = vadd.f32 %v1033_v38, %v405_v54 }
  0xf8   :  { %vm519_vm10 = vcmp.ge.f32.partialorder %v443_v52, 0.0  ;;  %v576_v57 = vmul.f32 0.01, %v443_v52 }
  0xf9   :  { %vm488_vm11 = vcmp.ge.f32.partialorder %v366_v55, 0.0  ;;  %v545_v58 = vmul.f32 0.01, %v366_v55  ;;  %vm504_vm12 = vcmp.ge.f32.partialorder %v406_v56, 0.0  ;;  %v561_v59 = vmul.f32 0.01, %v406_v56 }
  0xfa   :  { %v633_v60 = vsel %vm519_vm10, %v443_v52, %v576_v57 }
  0xfb   :  { %691 = vst.msk [vmem:[%s1322_s3 + $0x168] sm:$0xff] %vm645_vm3, %v633_v60  ;;  %v602_v61 = vsel %vm488_vm11, %v366_v55, %v545_v58  ;;  %v618_v62 = vsel %vm504_vm12, %v406_v56, %v561_v59 }
  0xfc   :  { %660 = vst.msk [vmem:[%s1322_s3 + $0x70] sm:$0xff] %vm645_vm3, %v602_v61 }
  0xfd   :  { %676 = vst.msk [vmem:[%s1322_s3 + $0xf0] sm:$0xff] %vm645_vm3, %v618_v62  ;;  %v445_v63 = vpop.f32.mrf.mxu2 }
  0xfe   :  { %v446_v0 = vadd.f32 %v1033_v38, %v445_v63  ;;  %v367_v1 = vpop.f32.mrf.mxu0  ;;  %v407_v2 = vpop.f32.mrf.mxu1 }
  0xff   :  { %v368_v3 = vadd.f32 %v1033_v38, %v367_v1  ;;  %v408_v4 = vadd.f32 %v1033_v38, %v407_v2 }
 0x100   :  { %vm520_vm13 = vcmp.ge.f32.partialorder %v446_v0, 0.0  ;;  %v577_v5 = vmul.f32 0.01, %v446_v0 }
 0x101   :  { %vm489_vm14 = vcmp.ge.f32.partialorder %v368_v3, 0.0  ;;  %v546_v6 = vmul.f32 0.01, %v368_v3  ;;  %vm505_vm15 = vcmp.ge.f32.partialorder %v408_v4, 0.0  ;;  %v562_v7 = vmul.f32 0.01, %v408_v4 }
 0x102   :  { %v634_v8 = vsel %vm520_vm13, %v446_v0, %v577_v5 }
 0x103   :  { %692 = vst.msk [vmem:[%s1322_s3 + $0x170] sm:$0xff] %vm645_vm3, %v634_v8  ;;  %v603_v9 = vsel %vm489_vm14, %v368_v3, %v546_v6  ;;  %v619_v10 = vsel %vm505_vm15, %v408_v4, %v562_v7 }
 0x104   :  { %661 = vst.msk [vmem:[%s1322_s3 + $0x78] sm:$0xff] %vm645_vm3, %v603_v9 }
 0x105   :  { %677 = vst.msk [vmem:[%s1322_s3 + $0xf8] sm:$0xff] %vm645_vm3, %v619_v10  ;;  %v447_v11 = vpop.f32.mrf.mxu2 }
 0x106   :  { %v448_v12 = vadd.f32 %v1033_v38, %v447_v11 }
 0x108   :  { %vm521_vm0 = vcmp.ge.f32.partialorder %v448_v12, 0.0  ;;  %v578_v13 = vmul.f32 0.01, %v448_v12 }
 0x10a   :  { %v635_v14 = vsel %vm521_vm0, %v448_v12, %v578_v13 }
 0x10b   :  { %693 = vst.msk [vmem:[%s1322_s3 + $0x178] sm:$0xff] %vm645_vm3, %v635_v14 }

// kernel: forward.12
= control target key start
LH: loop header
LB: loop body
LE: loop exit
PB: predicated region body
PF: predicated region fallthrough
CT: control target
= control target key end

     0   :  { %vm123_vm0 = vcmask 1043456   ;;  %vm101_vm1 = vcmask 588800   ;;  %vm209_vm2 = vcmask 130048   ;;  %vm222_vm14 = vcmask 123904   ;;  %s433_s1 = inlined_call_operand.vmem [shape: bf16[72,16], index: 1, kind: input, shape index: {}]   ;;  %s434_s2 = inlined_call_operand.vmem [shape: f32[1,16], index: 2, kind: input, shape index: {}]   ;;  %s435_s0 = inlined_call_operand.vmem [shape: bf16[98,72], index: 0, kind: input, shape index: {}]   ;;  %s436_s3 = inlined_call_operand.vmem [shape: f32[98,16], index: 3, kind: output, shape index: {}]  }
   0x1   :  { %v36_v0 = vld [vmem:[%s433_s1 + $0x20] sm:$0xf]  ;;  %v284_v4 = vld [vmem:[%s433_s1 + $0x18] sm:$0xff]  ;;  %v283_v5 = vld [vmem:[%s433_s1 + $0x10] sm:$0xff] }
   0x2   :  { %v91_v1 = vunpack.c.l.b16 %v36_v0  ;;  %v282_v6 = vld [vmem:[%s433_s1 + $0x8] sm:$0xff]  ;;  %v281_v7 = vld [vmem:[%s433_s1] sm:$0xff]  ;;  %v277_v9 = vld [vmem:[%s435_s0 + $0x10] sm:$0xff] }
   0x3   :  { %v275_v8 = vld [vmem:[%s435_s0] sm:$0xff]  ;;  %v280_v11 = vld [vmem:[%s435_s0 + $0x28] sm:$0xff]  ;;  %v27_v12 = vld [vmem:[%s435_s0 + $0x30] sm:$0x1] }
   0x4   :  { %v96_v2 = vpack.c.b16 %v91_v1, %v91_v1  ;;  %v279_v10 = vld [vmem:[%s435_s0 + $0x20] sm:$0xff]  ;;  %v66_v13 = vunpack.c.l.b16 %v27_v12  ;;  %v276_v14 = vld [vmem:[%s435_s0 + $0x8] sm:$0xff]  ;;  %v278_v15 = vld [vmem:[%s435_s0 + $0x18] sm:$0xff] }
   0x5   :  { %v367_v17 = vld [vmem:[%s434_s2] ss:$0 sm:$0xff] }
   0x6   :  { %v125_v3 = vsel %vm123_vm0, %v96_v2, 0  ;;  %v73_v16 = vpack.c.b16 %v66_v13, %v66_v13 }
   0x7   :  { %130 = vmatpush.bf16.msra.mxu0 %v125_v3  ;;  %285 = vmatpush.bf16.msra.mxu1 %v125_v3 }
   0x8   :  { %286 = vmatpush.bf16.msra.mxu2 %v125_v3  ;;  %287 = vmatpush.bf16.msra.mxu3 %v125_v3 }
   0xb   :  { %131 = vmatpush.bf16.msra.mxu0 %v284_v4  ;;  %288 = vmatpush.bf16.msra.mxu1 %v284_v4 }
   0xc   :  { %289 = vmatpush.bf16.msra.mxu2 %v284_v4  ;;  %290 = vmatpush.bf16.msra.mxu3 %v284_v4 }
   0xf   :  { %132 = vmatpush.bf16.msra.mxu0 %v283_v5  ;;  %291 = vmatpush.bf16.msra.mxu1 %v283_v5 }
  0x10   :  { %292 = vmatpush.bf16.msra.mxu2 %v283_v5  ;;  %293 = vmatpush.bf16.msra.mxu3 %v283_v5 }
  0x13   :  { %133 = vmatpush.bf16.msra.mxu0 %v282_v6  ;;  %294 = vmatpush.bf16.msra.mxu1 %v282_v6 }
  0x14   :  { %295 = vmatpush.bf16.msra.mxu2 %v282_v6  ;;  %296 = vmatpush.bf16.msra.mxu3 %v282_v6 }
  0x17   :  { %134 = vmatpush.bf16.msra.mxu0 %v281_v7  ;;  %297 = vmatpush.bf16.msra.mxu1 %v281_v7 }
  0x18   :  { %298 = vmatpush.bf16.msra.mxu2 %v281_v7  ;;  %299 = vmatpush.bf16.msra.mxu3 %v281_v7 }
  0x1a   :  { %268 = vmatmul.msk.bf16.vlgmr.msra.gmra.mxu0 %vm101_vm1, %v275_v8  ;;  %270 = vmatmul.msk.bf16.vlgmr.msra.gmra.mxu1 %vm101_vm1, %v277_v9 }
  0x1b   :  { %272 = vmatmul.msk.bf16.vlgmr.msra.gmra.mxu2 %vm101_vm1, %v279_v10  ;;  %273 = vmatmul.msk.bf16.vlgmr.msra.gmra.mxu3 %vm101_vm1, %v280_v11 }
  0x2a   :  { %269 = vmatmul.msk.bf16.gmra.mxu0 %vm101_vm1, %v276_v14  ;;  %271 = vmatmul.msk.bf16.gmra.mxu1 %vm101_vm1, %v278_v15 }
  0x2b   :  { %274 = vmatmul.msk.bf16.gmra.mxu3 %vm101_vm1, %v73_v16 }
  0x97   :  { %v136_v18 = vpop.f32.mrf.mxu0  ;;  %v146_v19 = vpop.f32.mrf.mxu1 }
  0x98   :  { %v137_v20 = vadd.f32 %v367_v17, %v136_v18  ;;  %v147_v21 = vadd.f32 %v367_v17, %v146_v19 }
  0x9a   :  { %vm170_vm3 = vcmp.ge.f32.partialorder %v137_v20, 0.0  ;;  %v183_v22 = vmul.f32 0.01, %v137_v20  ;;  %vm174_vm4 = vcmp.ge.f32.partialorder %v147_v21, 0.0  ;;  %v187_v23 = vmul.f32 0.01, %v147_v21 }
  0x9c   :  { %v196_v24 = vsel %vm170_vm3, %v137_v20, %v183_v22  ;;  %v200_v25 = vsel %vm174_vm4, %v147_v21, %v187_v23 }
  0x9d   :  { %210 = vst.msk [vmem:[%s436_s3] sm:$0xff] %vm209_vm2, %v196_v24 }
  0x9e   :  { %214 = vst.msk [vmem:[%s436_s3 + $0x20] sm:$0xff] %vm209_vm2, %v200_v25  ;;  %v156_v26 = vpop.f32.mrf.mxu2  ;;  %v161_v27 = vpop.f32.mrf.mxu3 }
  0x9f   :  { %v157_v28 = vadd.f32 %v367_v17, %v156_v26  ;;  %v162_v29 = vadd.f32 %v367_v17, %v161_v27  ;;  %v138_v30 = vpop.f32.mrf.mxu0  ;;  %v148_v31 = vpop.f32.mrf.mxu1 }
  0xa0   :  { %v139_v32 = vadd.f32 %v367_v17, %v138_v30  ;;  %v149_v33 = vadd.f32 %v367_v17, %v148_v31 }
  0xa1   :  { %vm178_vm5 = vcmp.ge.f32.partialorder %v157_v28, 0.0  ;;  %v191_v34 = vmul.f32 0.01, %v157_v28  ;;  %vm180_vm6 = vcmp.ge.f32.partialorder %v162_v29, 0.0  ;;  %v193_v35 = vmul.f32 0.01, %v162_v29 }
  0xa2   :  { %vm171_vm7 = vcmp.ge.f32.partialorder %v139_v32, 0.0  ;;  %v184_v36 = vmul.f32 0.01, %v139_v32  ;;  %vm175_vm8 = vcmp.ge.f32.partialorder %v149_v33, 0.0  ;;  %v188_v37 = vmul.f32 0.01, %v149_v33 }
  0xa3   :  { %v204_v38 = vsel %vm178_vm5, %v157_v28, %v191_v34  ;;  %v206_v39 = vsel %vm180_vm6, %v162_v29, %v193_v35 }
  0xa4   :  { %218 = vst.msk [vmem:[%s436_s3 + $0x40] sm:$0xff] %vm209_vm2, %v204_v38  ;;  %v197_v40 = vsel %vm171_vm7, %v139_v32, %v184_v36  ;;  %v201_v41 = vsel %vm175_vm8, %v149_v33, %v188_v37 }
  0xa5   :  { %220 = vst.msk [vmem:[%s436_s3 + $0x50] sm:$0xff] %vm209_vm2, %v206_v39 }
  0xa6   :  { %211 = vst.msk [vmem:[%s436_s3 + $0x8] sm:$0xff] %vm209_vm2, %v197_v40  ;;  %v158_v42 = vpop.f32.mrf.mxu2  ;;  %v163_v43 = vpop.f32.mrf.mxu3 }
  0xa7   :  { %215 = vst.msk [vmem:[%s436_s3 + $0x28] sm:$0xff] %vm209_vm2, %v201_v41  ;;  %v159_v44 = vadd.f32 %v367_v17, %v158_v42  ;;  %v164_v45 = vadd.f32 %v367_v17, %v163_v43  ;;  %v141_v46 = vpop.f32.mrf.mxu0  ;;  %v151_v47 = vpop.f32.mrf.mxu1 }
  0xa8   :  { %v142_v48 = vadd.f32 %v367_v17, %v141_v46  ;;  %v152_v49 = vadd.f32 %v367_v17, %v151_v47 }
  0xa9   :  { %vm179_vm9 = vcmp.ge.f32.partialorder %v159_v44, 0.0  ;;  %v192_v50 = vmul.f32 0.01, %v159_v44  ;;  %vm181_vm10 = vcmp.ge.f32.partialorder %v164_v45, 0.0  ;;  %v194_v51 = vmul.f32 0.01, %v164_v45 }
  0xaa   :  { %vm172_vm11 = vcmp.ge.f32.partialorder %v142_v48, 0.0  ;;  %v185_v52 = vmul.f32 0.01, %v142_v48  ;;  %vm176_vm12 = vcmp.ge.f32.partialorder %v152_v49, 0.0  ;;  %v189_v53 = vmul.f32 0.01, %v152_v49 }
  0xab   :  { %v205_v54 = vsel %vm179_vm9, %v159_v44, %v192_v50  ;;  %v207_v55 = vsel %vm181_vm10, %v164_v45, %v194_v51 }
  0xac   :  { %219 = vst.msk [vmem:[%s436_s3 + $0x48] sm:$0xff] %vm209_vm2, %v205_v54  ;;  %v198_v56 = vsel %vm172_vm11, %v142_v48, %v185_v52  ;;  %v202_v57 = vsel %vm176_vm12, %v152_v49, %v189_v53 }
  0xad   :  { %221 = vst.msk [vmem:[%s436_s3 + $0x58] sm:$0xff] %vm209_vm2, %v207_v55 }
  0xae   :  { %212 = vst.msk [vmem:[%s436_s3 + $0x10] sm:$0xff] %vm209_vm2, %v198_v56  ;;  %v166_v58 = vpop.f32.mrf.mxu3 }
  0xaf   :  { %216 = vst.msk [vmem:[%s436_s3 + $0x30] sm:$0xff] %vm209_vm2, %v202_v57  ;;  %v167_v59 = vadd.f32 %v367_v17, %v166_v58  ;;  %v143_v60 = vpop.f32.mrf.mxu0  ;;  %v153_v61 = vpop.f32.mrf.mxu1 }
  0xb0   :  { %v144_v62 = vadd.f32 %v367_v17, %v143_v60  ;;  %v154_v63 = vadd.f32 %v367_v17, %v153_v61 }
  0xb1   :  { %vm182_vm13 = vcmp.ge.f32.partialorder %v167_v59, 0.0  ;;  %v195_v0 = vmul.f32 0.01, %v167_v59 }
  0xb2   :  { %vm173_vm15 = vcmp.ge.f32.partialorder %v144_v62, 0.0  ;;  %v186_v1 = vmul.f32 0.01, %v144_v62  ;;  %vm177_vm0 = vcmp.ge.f32.partialorder %v154_v63, 0.0  ;;  %v190_v2 = vmul.f32 0.01, %v154_v63 }
  0xb3   :  { %v208_v3 = vsel %vm182_vm13, %v167_v59, %v195_v0 }
  0xb4   :  { %223 = vst.msk [vmem:[%s436_s3 + $0x60] sm:$0x3] %vm222_vm14, %v208_v3  ;;  %v199_v4 = vsel %vm173_vm15, %v144_v62, %v186_v1  ;;  %v203_v5 = vsel %vm177_vm0, %v154_v63, %v190_v2 }
  0xb5   :  { %213 = vst.msk [vmem:[%s436_s3 + $0x18] sm:$0xff] %vm209_vm2, %v199_v4 }
  0xb6   :  { %217 = vst.msk [vmem:[%s436_s3 + $0x38] sm:$0xff] %vm209_vm2, %v203_v5  ;;  %v168_v6 = vpop.f32.mrf.mxu3 }

// kernel: forward.13
= control target key start
LH: loop header
LB: loop body
LE: loop exit
PB: predicated region body
PF: predicated region fallthrough
CT: control target
= control target key end

     0   :  { %vm109_vm0 = vcmask 130048   ;;  %vm161_vm2 = vcmask 261120   ;;  %vm164_vm4 = vcmask 254976   ;;  %s314_s1 = inlined_call_operand.vmem [shape: bf16[144,32], index: 1, kind: input, shape index: {}]   ;;  %s315_s0 = inlined_call_operand.vmem [shape: bf16[18,144], index: 0, kind: input, shape index: {}]   ;;  %s316_s2 = inlined_call_operand.vmem [shape: f32[1,32], index: 2, kind: input, shape index: {}]   ;;  %s317_s3 = inlined_call_operand.vmem [shape: f32[18,32], index: 3, kind: output, shape index: {}]  }
   0x1   :  { %v225_v0 = vld [vmem:[%s314_s1 + $0x38] sm:$0xff]  ;;  %v226_v1 = vld [vmem:[%s314_s1 + $0x40] sm:$0xff]  ;;  %v224_v3 = vld [vmem:[%s314_s1 + $0x30] sm:$0xff] }
   0x2   :  { %v216_v2 = vld [vmem:[%s315_s0 + $0x4] sm:$0xf]  ;;  %116 = vmatpush.bf16.msra.mxu0 %v225_v0  ;;  %227 = vmatpush.bf16.msra.mxu2 %v225_v0  ;;  %v174_v4 = vld [vmem:[%s315_s0 + $0x8] sm:$0xf0]  ;;  %v17_v8 = vld [vmem:[%s315_s0 + $0x10] sm:$0x11] }
   0x3   :  { %141 = vmatpush.bf16.msra.mxu1 %v226_v1  ;;  %v177_v5 = vor.u32 %v216_v2, %v174_v4  ;;  %v223_v6 = vld [vmem:[%s314_s1 + $0x28] sm:$0xff]  ;;  %v222_v7 = vld [vmem:[%s314_s1 + $0x20] sm:$0xff]  ;;  %v221_v9 = vld [vmem:[%s314_s1 + $0x18] sm:$0xff]  ;;  %v48_v10 = vunpack.c.h.b16 %v17_v8  ;;  %v47_v14 = vunpack.c.l.b16 %v17_v8 }
   0x4   :  { %v220_v11 = vld [vmem:[%s314_s1 + $0x10] sm:$0xff]  ;;  %v219_v13 = vld [vmem:[%s314_s1 + $0x8] sm:$0xff]  ;;  %v218_v15 = vld [vmem:[%s314_s1] sm:$0xff] }
   0x5   :  { %v52_v12 = vpack.c.b16 %v48_v10, %v48_v10  ;;  %v172_v16 = vld [vmem:[%s315_s0] sm:$0xf]  ;;  %v217_v17 = vld [vmem:[%s315_s0 + $0x4] sm:$0xf0]  ;;  %v51_v19 = vpack.c.b16 %v47_v14, %v47_v14 }
   0x6   :  { %117 = vmatpush.bf16.msra.mxu0 %v224_v3  ;;  %228 = vmatpush.bf16.msra.mxu2 %v224_v3  ;;  %v173_v18 = vor.u32 %v217_v17, %v172_v16  ;;  %v235_v23 = vld [vmem:[%s316_s2] ss:$0 sm:$0xff] }
   0x7   :  { %214 = vmatmul.msk.bf16.vlgmr.msra.gmra.mxu1 %vm109_vm0, %v177_v5 }
   0xa   :  { %118 = vmatpush.bf16.msra.mxu0 %v223_v6  ;;  %229 = vmatpush.bf16.msra.mxu2 %v223_v6 }
   0xe   :  { %119 = vmatpush.bf16.msra.mxu0 %v222_v7  ;;  %230 = vmatpush.bf16.msra.mxu2 %v222_v7 }
  0x12   :  { %120 = vmatpush.bf16.msra.mxu0 %v221_v9  ;;  %231 = vmatpush.bf16.msra.mxu2 %v221_v9 }
  0x16   :  { %121 = vmatpush.bf16.msra.mxu0 %v220_v11  ;;  %232 = vmatpush.bf16.msra.mxu2 %v220_v11 }
  0x17   :  { %215 = vmatmul.msk.bf16.gmra.mxu1 %vm109_vm0, %v52_v12 }
  0x1a   :  { %122 = vmatpush.bf16.msra.mxu0 %v219_v13  ;;  %233 = vmatpush.bf16.msra.mxu2 %v219_v13 }
  0x1e   :  { %123 = vmatpush.bf16.msra.mxu0 %v218_v15  ;;  %234 = vmatpush.bf16.msra.mxu2 %v218_v15 }
  0x21   :  { %124 = vmatmul.bf16.vlgmr.msra.gmra.mxu0 %v173_v18  ;;  %129 = vmatmul.bf16.vlgmr.msra.gmra.mxu2 %v51_v19 }
  0x84   :  { %v143_v20 = vpop.f32.mrf.mxu1 }
  0x8c   :  { %v145_v21 = vpop.f32.mrf.mxu1 }
  0x94   :  { %v148_v22 = vpop.f32.mrf.mxu1 }
  0x9c   :  { %v150_v24 = vpop.f32.mrf.mxu1 }
  0x9e   :  { %v125_v25 = vpop.f32.mrf.mxu0 }
  0x9f   :  { %v126_v26 = vadd.f32 %v235_v23, %v125_v25 }
  0xa1   :  { %v144_v27 = vadd.f32 %v143_v20, %v126_v26 }
  0xa3   :  { %vm152_vm1 = vcmp.ge.f32.partialorder %v144_v27, 0.0  ;;  %v155_v28 = vmul.f32 0.01, %v144_v27 }
  0xa4   :  { %v130_v29 = vpop.f32.mrf.mxu2 }
  0xa5   :  { %v158_v30 = vsel %vm152_vm1, %v144_v27, %v155_v28  ;;  %v131_v31 = vadd.f32 %v235_v23, %v130_v29 }
  0xa6   :  { %162 = vst.msk [vmem:[%s317_s3] sm:$0xff] %vm161_vm2, %v158_v30  ;;  %v127_v32 = vpop.f32.mrf.mxu0 }
  0xa7   :  { %v149_v33 = vadd.f32 %v148_v22, %v131_v31  ;;  %v128_v34 = vadd.f32 %v235_v23, %v127_v32 }
  0xa9   :  { %vm154_vm3 = vcmp.ge.f32.partialorder %v149_v33, 0.0  ;;  %v157_v35 = vmul.f32 0.01, %v149_v33  ;;  %v146_v36 = vadd.f32 %v145_v21, %v128_v34 }
  0xab   :  { %v160_v37 = vsel %vm154_vm3, %v149_v33, %v157_v35  ;;  %vm153_vm5 = vcmp.ge.f32.partialorder %v146_v36, 0.0  ;;  %v156_v38 = vmul.f32 0.01, %v146_v36 }
  0xac   :  { %165 = vst.msk [vmem:[%s317_s3 + $0x10] sm:$0x3] %vm164_vm4, %v160_v37  ;;  %v132_v39 = vpop.f32.mrf.mxu2 }
  0xad   :  { %v159_v40 = vsel %vm153_vm5, %v146_v36, %v156_v38 }
  0xae   :  { %163 = vst.msk [vmem:[%s317_s3 + $0x8] sm:$0xff] %vm161_vm2, %v159_v40 }

// kernel: forward.18
= control target key start
LH: loop header
LB: loop body
LE: loop exit
PB: predicated region body
PF: predicated region fallthrough
CT: control target
= control target key end

     0   :  { %vm205_vm0 = vcmask 261120   ;;  %vm250_vm2 = vcmask 517120   ;;  %s439_s0 = inlined_call_operand.vmem [shape: bf16[288,64], index: 0, kind: input, shape index: {}]   ;;  %s440_s1 = inlined_call_operand.vmem [shape: f32[1,64], index: 1, kind: input, shape index: {}]   ;;  %s441_s2 = inlined_call_operand.vmem [shape: bf16[2,1,1,288], index: 2, kind: input, shape index: {}]   ;;  %s442_s3 = inlined_call_operand.vmem [shape: f32[2,64], index: 3, kind: output, shape index: {}]  }
   0x1   :  { %v338_v0 = vld [vmem:[%s439_s0 + $0x38] sm:$0xff]  ;;  %v337_v2 = vld [vmem:[%s439_s0 + $0x30] sm:$0xff]  ;;  %v348_v4 = vld [vmem:[%s439_s0 + $0x88] sm:$0xff] }
   0x2   :  { %v346_v1 = vld [vmem:[%s439_s0 + $0x78] sm:$0xff]  ;;  %208 = vmatpush.bf16.msra.mxu0 %v338_v0  ;;  %v345_v3 = vld [vmem:[%s439_s0 + $0x70] sm:$0xff]  ;;  %v347_v5 = vld [vmem:[%s439_s0 + $0x80] sm:$0xff]  ;;  %240 = vmatpush.bf16.msra.mxu2 %v348_v4 }
   0x3   :  { %221 = vmatpush.bf16.msra.mxu1 %v346_v1  ;;  %v17_v6 = vld [vmem:[%s441_s2] sm:$0x1]  ;;  %v256_v7 = vld [vmem:[%s441_s2 + $0x1] sm:$0x1]  ;;  %v257_v8 = vld [vmem:[%s441_s2 + $0x2] sm:$0x1] }
   0x4   :  { %v18_v9 = vunpack.c.l.bf16 %v17_v6  ;;  %v29_v10 = vunpack.c.l.bf16 %v256_v7  ;;  %v41_v11 = vunpack.c.l.bf16 %v257_v8  ;;  %v336_v12 = vld [vmem:[%s439_s0 + $0x28] sm:$0xff]  ;;  %v335_v17 = vld [vmem:[%s439_s0 + $0x20] sm:$0xff]  ;;  %v334_v19 = vld [vmem:[%s439_s0 + $0x18] sm:$0xff] }
   0x5   :  { %v344_v13 = vld [vmem:[%s439_s0 + $0x68] sm:$0xff]  ;;  %v343_v18 = vld [vmem:[%s439_s0 + $0x60] sm:$0xff]  ;;  %v342_v20 = vld [vmem:[%s439_s0 + $0x58] sm:$0xff] }
   0x6   :  { %209 = vmatpush.bf16.msra.mxu0 %v337_v2  ;;  %v20_v14 = vpack.c.bf16 0.0, %v18_v9  ;;  %v32_v15 = vpack.c.bf16 0.0, %v29_v10  ;;  %v44_v16 = vpack.c.bf16 0.0, %v41_v11  ;;  %241 = vmatpush.bf16.msra.mxu2 %v347_v5  ;;  %v333_v22 = vld [vmem:[%s439_s0 + $0x10] sm:$0xff]  ;;  %v332_v24 = vld [vmem:[%s439_s0 + $0x8] sm:$0xff]  ;;  %v331_v27 = vld [vmem:[%s439_s0] sm:$0xff] }
   0x7   :  { %222 = vmatpush.bf16.msra.mxu1 %v345_v3  ;;  %v341_v23 = vld [vmem:[%s439_s0 + $0x50] sm:$0xff]  ;;  %v340_v25 = vld [vmem:[%s439_s0 + $0x48] sm:$0xff]  ;;  %v339_v28 = vld [vmem:[%s439_s0 + $0x40] sm:$0xff] }
   0x8   :  { %23 = vst [vmem:[#allocation2] sm:$0x1] %v20_v14  ;;  %v349_v31 = vld [vmem:[%s440_s1] ss:$0 sm:$0xff] }
   0x9   :  { %35 = vst [vmem:[#allocation2 + $0x1] sm:$0x1] %v32_v15 }
   0xa   :  { %210 = vmatpush.bf16.msra.mxu0 %v336_v12  ;;  %47 = vst [vmem:[#allocation2 + $0x2] sm:$0x1] %v44_v16 }
   0xb   :  { %223 = vmatpush.bf16.msra.mxu1 %v344_v13 }
   0xe   :  { %211 = vmatpush.bf16.msra.mxu0 %v335_v17 }
   0xf   :  { %224 = vmatpush.bf16.msra.mxu1 %v343_v18 }
  0x11   :  { %v49_v21 = vld [vmem:[#allocation2] sm:$0x7] }
  0x12   :  { %212 = vmatpush.bf16.msra.mxu0 %v334_v19  ;;  %91 = vst [vmem:[#allocation1] ss:$9 sm:$0xff] %v49_v21 }
  0x13   :  { %225 = vmatpush.bf16.msra.mxu1 %v342_v20 }
  0x16   :  { %213 = vmatpush.bf16.msra.mxu0 %v333_v22 }
  0x17   :  { %226 = vmatpush.bf16.msra.mxu1 %v341_v23 }
  0x19   :  { %v94_v26 = vld [vmem:[#allocation1 + $0x12] sm:$0xff]  ;;  %v92_v29 = vld [vmem:[#allocation1] sm:$0xff]  ;;  %v93_v30 = vld [vmem:[#allocation1 + $0x9] sm:$0xff] }
  0x1a   :  { %214 = vmatpush.bf16.msra.mxu0 %v332_v24  ;;  %330 = vmatmul.msk.bf16.vlgmr.msra.gmra.mxu2 %vm205_vm0, %v94_v26 }
  0x1b   :  { %227 = vmatpush.bf16.msra.mxu1 %v340_v25 }
  0x1e   :  { %215 = vmatpush.bf16.msra.mxu0 %v331_v27 }
  0x1f   :  { %228 = vmatpush.bf16.msra.mxu1 %v339_v28 }
  0x21   :  { %216 = vmatmul.bf16.vlgmr.msra.gmra.mxu0 %v92_v29 }
  0x22   :  { %229 = vmatmul.bf16.vlgmr.msra.gmra.mxu1 %v93_v30 }
  0x9d   :  { %v243_v32 = vpop.f32.mrf.mxu2 }
  0x9e   :  { %v217_v33 = vpop.f32.mrf.mxu0 }
  0x9f   :  { %v218_v34 = vadd.f32 %v349_v31, %v217_v33  ;;  %v230_v35 = vpop.f32.mrf.mxu1 }
  0xa1   :  { %v231_v36 = vadd.f32 %v230_v35, %v218_v34 }
  0xa3   :  { %v244_v37 = vadd.f32 %v243_v32, %v231_v36 }
  0xa5   :  { %vm247_vm1 = vcmp.ge.f32.partialorder %v244_v37, 0.0  ;;  %v248_v38 = vmul.f32 0.01, %v244_v37  ;;  %v245_v39 = vpop.f32.mrf.mxu2 }
  0xa6   :  { %v219_v40 = vpop.f32.mrf.mxu0 }
  0xa7   :  { %v249_v41 = vsel %vm247_vm1, %v244_v37, %v248_v38  ;;  %v232_v42 = vpop.f32.mrf.mxu1 }
  0xa8   :  { %251 = vst.msk [vmem:[%s442_s3] sm:$0x3] %vm250_vm2, %v249_v41 }

// kernel: forward.19
= control target key start
LH: loop header
LB: loop body
LE: loop exit
PB: predicated region body
PF: predicated region fallthrough
CT: control target
= control target key end

     0   :  { %v17_v2 = vlaneseq  ;;  %s245_s27 = smov 8   ;;  %vm118_vm1 = vcmask 523264   ;;  %vm171_vm2 = vcmask 1043458   ;;  %vm166_vm3 = vcmask 1041408   ;;  %s350_s0 = inlined_call_operand.vmem [shape: bf16[64,288], index: 0, kind: input, shape index: {}]   ;;  %s351_s1 = inlined_call_operand.vmem [shape: f32[1,288], index: 1, kind: input, shape index: {}]   ;;  %s352_s2 = inlined_call_operand.vmem [shape: f32[2,256], index: 2, kind: input, shape index: {}]   ;;  %s353_s3 = inlined_call_operand.vmem [shape: f32[2,288], index: 3, kind: output, shape index: {}]  }
   0x1   :  { %v14_v0 = vld [vmem:[%s352_s2] sm:$0x3]  ;;  %v180_v1 = vld [vmem:[%s352_s2 + $0x2] sm:$0x3]  ;;  %v219_v3 = vld [vmem:[%s350_s0 + $0x48] sm:$0xf] }
   0x2   :  { %v242_v4 = vld [vmem:[%s350_s0 + $0x50] sm:$0xf0]  ;;  %v241_v5 = vld [vmem:[%s350_s0 + $0x4c] sm:$0xf]  ;;  %v18_v6 = vand.u32 127, %v17_v2  ;;  %vm172_vm4 = vmor %vm171_vm2, %vm166_vm3  ;;  %vm173_vm5 = vcmask 259076  }
   0x3   :  { %v220_v7 = vor.u32 %v242_v4, %v219_v3  ;;  %v221_v8 = vld [vmem:[%s350_s0 + $0x54] sm:$0xf0]  ;;  %v227_v9 = vld [vmem:[%s350_s0 + $0x50] sm:$0xf]  ;;  %v243_v11 = vld [vmem:[%s350_s0 + $0x58] sm:$0xf0] }
   0x4   :  { %v224_v10 = vor.u32 %v241_v5, %v221_v8  ;;  %vm19_vm0 = vcmp.lt.s32.totalorder %v18_v6, 120  ;;  %v228_v12 = vor.u32 %v243_v11, %v227_v9  ;;  %v207_v14 = vld [vmem:[%s350_s0 + $0x30] sm:$0xf]  ;;  %v239_v15 = vld [vmem:[%s350_s0 + $0x38] sm:$0xf0]  ;;  %vm168_vm6 = vcmask 1043456   ;;  %vm174_vm7 = vmor %vm173_vm5, %vm172_vm4 }
   0x5   :  { %126 = vmatpush.bf16.msra.mxu0 %v220_v7  ;;  %v20_v13 = vsel %vm19_vm0, %v180_v1, %v14_v0  ;;  %v238_v16 = vld [vmem:[%s350_s0 + $0x34] sm:$0xf]  ;;  %v208_v17 = vor.u32 %v239_v15, %v207_v14  ;;  %v209_v18 = vld [vmem:[%s350_s0 + $0x3c] sm:$0xf0]  ;;  %v215_v19 = vld [vmem:[%s350_s0 + $0x38] sm:$0xf] }
   0x6   :  { %139 = vmatpush.bf16.msra.mxu1 %v224_v10  ;;  %21 = vrot.lane.b32.xlu0 %v20_v13, %s245_s27  ;;  %v240_v20 = vld [vmem:[%s350_s0 + $0x40] sm:$0xf0]  ;;  %v212_v21 = vor.u32 %v238_v16, %v209_v18  ;;  %v195_v23 = vld [vmem:[%s350_s0 + $0x18] sm:$0xf]  ;;  %v235_v25 = vld [vmem:[%s350_s0 + $0x1c] sm:$0xf] }
   0x7   :  { %152 = vmatpush.bf16.msra.mxu2 %v228_v12  ;;  %v216_v22 = vor.u32 %v240_v20, %v215_v19  ;;  %v236_v24 = vld [vmem:[%s350_s0 + $0x20] sm:$0xf0]  ;;  %v197_v27 = vld [vmem:[%s350_s0 + $0x24] sm:$0xf0]  ;;  %v203_v28 = vld [vmem:[%s350_s0 + $0x20] sm:$0xf] }
   0x8   :  { %v196_v26 = vor.u32 %v236_v24, %v195_v23  ;;  %v237_v29 = vld [vmem:[%s350_s0 + $0x28] sm:$0xf0]  ;;  %v200_v30 = vor.u32 %v235_v25, %v197_v27  ;;  %v183_v32 = vld [vmem:[%s350_s0] sm:$0xf]  ;;  %v232_v34 = vld [vmem:[%s350_s0 + $0x4] sm:$0xf] }
   0x9   :  { %127 = vmatpush.bf16.msra.mxu0 %v208_v17  ;;  %v204_v31 = vor.u32 %v237_v29, %v203_v28  ;;  %v233_v33 = vld [vmem:[%s350_s0 + $0x8] sm:$0xf0]  ;;  %v185_v36 = vld [vmem:[%s350_s0 + $0xc] sm:$0xf0]  ;;  %v191_v37 = vld [vmem:[%s350_s0 + $0x8] sm:$0xf] }
   0xa   :  { %140 = vmatpush.bf16.msra.mxu1 %v212_v21  ;;  %v184_v35 = vor.u32 %v233_v33, %v183_v32  ;;  %v234_v38 = vld [vmem:[%s350_s0 + $0x10] sm:$0xf0]  ;;  %v188_v39 = vor.u32 %v232_v34, %v185_v36  ;;  %v46_v44 = vld [vmem:[%s351_s1] sm:$0x7] }
   0xb   :  { %153 = vmatpush.bf16.msra.mxu2 %v216_v22  ;;  %v192_v40 = vor.u32 %v234_v38, %v191_v37  ;;  %v49_v45 = vperm.slane %v46_v44, 1  ;;  %v50_v49 = vperm.slane %v46_v44, 2  ;;  %v48_v50 = vperm.slane %v46_v44, 0 }
   0xd   :  { %128 = vmatpush.bf16.msra.mxu0 %v196_v26 }
   0xe   :  { %141 = vmatpush.bf16.msra.mxu1 %v200_v30 }
   0xf   :  { %154 = vmatpush.bf16.msra.mxu2 %v204_v31 }
  0x11   :  { %129 = vmatpush.bf16.msra.mxu0 %v184_v35 }
  0x12   :  { %142 = vmatpush.bf16.msra.mxu1 %v188_v39 }
  0x13   :  { %155 = vmatpush.bf16.msra.mxu2 %v192_v40 }
  0x78   :  { %v22_v41 = vpop.permute.xlu0 %21 }
  0x79   :  { %v24_v42 = vpack.c.bf16 0.0, %v22_v41 }
  0x7b   :  { %27 = vst [vmem:[#allocation7] sm:$0x1] %v24_v42 }
  0x82   :  { %v29_v43 = vld [vmem:[#allocation7] sm:$0x1] }
  0x83   :  { %229 = vmatmul.msk.bf16.vlgmr.msra.gmra.mxu0 %vm118_vm1, %v29_v43  ;;  %230 = vmatmul.msk.bf16.vlgmr.msra.gmra.mxu1 %vm118_vm1, %v29_v43 }
  0x84   :  { %231 = vmatmul.msk.bf16.vlgmr.msra.gmra.mxu2 %vm118_vm1, %v29_v43 }
 0x100   :  { %v131_v46 = vpop.f32.mrf.mxu0  ;;  %v144_v47 = vpop.f32.mrf.mxu1 }
 0x101   :  { %v145_v48 = vadd.f32 %v144_v47, %v49_v45  ;;  %v132_v56 = vadd.f32 %v131_v46, %v48_v50 }
 0x103   :  { %v164_v51 = vrot.slane %v145_v48, 6 }
 0x105   :  { %v167_v58 = vsel %vm166_vm3, %v132_v56, %v164_v51 }
 0x107   :  { %v157_v52 = vpop.f32.mrf.mxu2 }
 0x108   :  { %v158_v53 = vadd.f32 %v157_v52, %v50_v49  ;;  %v133_v54 = vpop.f32.mrf.mxu0  ;;  %v146_v55 = vpop.f32.mrf.mxu1 }
 0x10a   :  { %v165_v57 = vrot.slane %v158_v53, 4 }
 0x10c   :  { %v169_v59 = vsel %vm168_vm6, %v167_v58, %v165_v57 }
 0x10d   :  { %175 = vst.msk [vmem:[%s353_s3] sm:$0x3f] %vm174_vm7, %v169_v59 }
 0x10f   :  { %v159_v60 = vpop.f32.mrf.mxu2 }

// kernel: forward.14
= control target key start
LH: loop header
LB: loop body
LE: loop exit
PB: predicated region body
PF: predicated region fallthrough
CT: control target
= control target key end

     0   :  { %vm54_vm0 = vcmask 523264   ;;  %vm89_vm2 = vcmask 261120   ;;  %vm125_vm4 = vcmask 326656   ;;  %s260_s19 = smov 40   ;;  %vm232_vm5 = vcmask 457728   ;;  %s437_s2 = inlined_call_operand.vmem [shape: f32[64,32], index: 2, kind: input, shape index: {}]   ;;  %s438_s4 = inlined_call_operand.vmem [shape: f32[32,40], index: 4, kind: input, shape index: {}]   ;;  %s439_s3 = inlined_call_operand.vmem [shape: f32[1,32], index: 3, kind: input, shape index: {}]   ;;  %s440_s0 = inlined_call_operand.vmem [shape: f32[2,64], index: 0, kind: input, shape index: {}]   ;;  %s441_s5 = inlined_call_operand.vmem [shape: f32[1,40], index: 5, kind: input, shape index: {}]   ;;  %s442_s6 = inlined_call_operand.vmem [shape: f32[40,40], index: 6, kind: input, shape index: {}]   ;;  %s443_s8 = inlined_call_operand.vmem [shape: f32[40,40], index: 8, kind: input, shape index: {}]   ;;  %s444_s7 = inlined_call_operand.vmem [shape: f32[1,40], index: 7, kind: input, shape index: {}]   ;;  %s445_s9 = inlined_call_operand.vmem [shape: f32[1,40], index: 9, kind: input, shape index: {}]   ;;  %s446_s10 = inlined_call_operand.vmem [shape: f32[40,64], index: 10, kind: input, shape index: {}]   ;;  %s447_s11 = inlined_call_operand.vmem [shape: f32[1,64], index: 11, kind: input, shape index: {}]   ;;  %s448_s1 = inlined_call_operand.vmem [shape: f32[2,40], index: 1, kind: input, shape index: {}]   ;;  %s449_s12 = inlined_call_operand.vmem [shape: f32[2,256], index: 12, kind: output, shape index: {}]  }
   0x1   :  { %v49_v0 = vld [vmem:[%s437_s2 + $0x38] sm:$0xff]  ;;  %v48_v1 = vld [vmem:[%s437_s2 + $0x30] sm:$0xff]  ;;  %v47_v2 = vld [vmem:[%s437_s2 + $0x28] sm:$0xff]  ;;  %vm228_vm6 = vcmask 654336   ;;  %vm230_vm7 = vcmask 982016   ;;  %vm237_vm8 = vcmask 1041408  }
   0x2   :  { %66 = vmatpush.msra.mxu0 %v49_v0  ;;  %v84_v3 = vld [vmem:[%s438_s4 + $0x18] sm:$0xff]  ;;  %v46_v4 = vld [vmem:[%s437_s2 + $0x20] sm:$0xff]  ;;  %v44_v6 = vld [vmem:[%s437_s2 + $0x10] sm:$0xff] }
   0x3   :  { %105 = vmatpush.msra.mxu1 %v84_v3  ;;  %v45_v5 = vld [vmem:[%s437_s2 + $0x18] sm:$0xff]  ;;  %v43_v7 = vld [vmem:[%s437_s2 + $0x8] sm:$0xff]  ;;  %v42_v8 = vld [vmem:[%s437_s2] sm:$0xff] }
   0x4   :  { %67 = vmatpush.msra.mxu0 %v48_v1  ;;  %v41_v9 = vld [vmem:[%s440_s0] sm:$0x3]  ;;  %v83_v10 = vld [vmem:[%s438_s4 + $0x10] sm:$0xff]  ;;  %v82_v11 = vld [vmem:[%s438_s4 + $0x8] sm:$0xff] }
   0x5   :  { %106 = vmatpush.msra.mxu1 %v83_v10  ;;  %v81_v12 = vld [vmem:[%s438_s4] sm:$0xff]  ;;  %v119_v15 = vld [vmem:[%s442_s6 + $0x18] sm:$0xff]  ;;  %v118_v22 = vld [vmem:[%s442_s6 + $0x10] sm:$0xff] }
   0x6   :  { %68 = vmatpush.msra.mxu0 %v47_v2  ;;  %v120_v13 = vld [vmem:[%s442_s6 + $0x20] sm:$0xff]  ;;  %v152_v16 = vld [vmem:[%s443_s8 + $0x18] sm:$0xff]  ;;  %v151_v23 = vld [vmem:[%s443_s8 + $0x10] sm:$0xff] }
   0x7   :  { %107 = vmatpush.msra.mxu1 %v82_v11  ;;  %v153_v14 = vld [vmem:[%s443_s8 + $0x20] sm:$0xff]  ;;  %140 = vmatpush.msra.mxu2 %v120_v13  ;;  %v117_v24 = vld [vmem:[%s442_s6 + $0x8] sm:$0xff]  ;;  %v187_v34 = vld [vmem:[%s446_s10 + $0x18] sm:$0xff] }
   0x8   :  { %69 = vmatpush.msra.mxu0 %v46_v4  ;;  %169 = vmatpush.msra.mxu3 %v153_v14  ;;  %v253_v17 = vld [vmem:[%s439_s3] ss:$0 sm:$0xff]  ;;  %v150_v25 = vld [vmem:[%s443_s8 + $0x8] sm:$0xff]  ;;  %v186_v35 = vld [vmem:[%s446_s10 + $0x10] sm:$0xff] }
   0x9   :  { %108 = vmatpush.msra.mxu1 %v81_v12  ;;  %141 = vmatpush.msra.mxu2 %v119_v15  ;;  %v116_v26 = vld [vmem:[%s442_s6] sm:$0xff]  ;;  %v185_v36 = vld [vmem:[%s446_s10 + $0x8] sm:$0xff] }
   0xa   :  { %70 = vmatpush.msra.mxu0 %v45_v5  ;;  %170 = vmatpush.msra.mxu3 %v152_v16  ;;  %v149_v27 = vld [vmem:[%s443_s8] sm:$0xff] }
   0xb   :  { %142 = vmatpush.msra.mxu2 %v118_v22  ;;  %v254_v28 = vld [vmem:[%s441_s5] ss:$0 sm:$0xff] }
   0xc   :  { %71 = vmatpush.msra.mxu0 %v44_v6  ;;  %171 = vmatpush.msra.mxu3 %v151_v23  ;;  %v188_v33 = vld [vmem:[%s446_s10 + $0x20] sm:$0xff] }
   0xd   :  { %143 = vmatpush.msra.mxu2 %v117_v24  ;;  %207 = vmatpush.msrb.mxu1 %v188_v33  ;;  %v184_v37 = vld [vmem:[%s446_s10] sm:$0xff] }
   0xe   :  { %72 = vmatpush.msra.mxu0 %v43_v7  ;;  %172 = vmatpush.msra.mxu3 %v150_v25  ;;  %v256_v38 = vld [vmem:[%s445_s9] ss:$0 sm:$0xff]  ;;  %s261_s9 = smov 80  }
   0xf   :  { %144 = vmatpush.msra.mxu2 %v116_v26  ;;  %208 = vmatpush.msrb.mxu1 %v187_v34  ;;  %v255_v43 = vld [vmem:[%s444_s7] ss:$0 sm:$0xff]  ;;  %s262_s7 = smov 120  }
  0x10   :  { %73 = vmatpush.msra.mxu0 %v42_v8  ;;  %173 = vmatpush.msra.mxu3 %v149_v27  ;;  %v181_v45 = vld [vmem:[%s448_s1] sm:$0x3] }
  0x11   :  { %245 = vmatmul.msk.f32.vlgmr.msra.gmra.mxu0 %vm54_vm0, %v41_v9  ;;  %209 = vmatpush.msrb.mxu1 %v186_v35  ;;  %v257_v50 = vld [vmem:[%s447_s11] ss:$0 sm:$0xff] }
  0x13   :  { %210 = vmatpush.msrb.mxu1 %v185_v36 }
  0x15   :  { %211 = vmatpush.msrb.mxu1 %v184_v37 }
  0x8e   :  { %v75_v18 = vpop.f32.mrf.mxu0 }
  0x8f   :  { %v76_v19 = vadd.f32 %v253_v17, %v75_v18 }
  0x91   :  { %v79_v20 = vmul.f32 0.01, %v76_v19  ;;  %vm78_vm1 = vcmp.ge.f32.partialorder %v76_v19, 0.0 }
  0x93   :  { %v80_v21 = vsel %vm78_vm1, %v76_v19, %v79_v20 }
  0x94   :  { %246 = vmatmul.msk.f32.vlgmr.msra.gmra.mxu1 %vm89_vm2, %v80_v21 }
 0x111   :  { %v110_v29 = vpop.f32.mrf.mxu1 }
 0x112   :  { %v111_v30 = vadd.f32 %v254_v28, %v110_v29 }
 0x114   :  { %v114_v31 = vmul.f32 0.01, %v111_v30  ;;  %vm113_vm3 = vcmp.ge.f32.partialorder %v111_v30, 0.0 }
 0x116   :  { %v115_v32 = vsel %vm113_vm3, %v111_v30, %v114_v31 }
 0x117   :  { %247 = vmatmul.msk.f32.vlgmr.msra.gmra.mxu2 %vm125_vm4, %v115_v32  ;;  %248 = vmatmul.msk.f32.vlgmr.msra.gmra.mxu3 %vm125_vm4, %v115_v32 }
 0x19a   :  { %v175_v39 = vpop.f32.mrf.mxu3  ;;  %v146_v44 = vpop.f32.mrf.mxu2 }
 0x19b   :  { %v176_v40 = vadd.f32 %v256_v38, %v175_v39  ;;  %v147_v47 = vadd.f32 %v255_v43, %v146_v44 }
 0x19d   :  { %v178_v41 = vmul.f32 0.5, %v176_v40  ;;  %217 = vrot.lane.b32.xlu0 %v176_v40, %s260_s19 }
 0x19f   :  { %v179_v42 = vmul.f32 1.442695, %v178_v41 }
 0x1a1   :  { %258 = vpow2.f32 %v179_v42 }
 0x1a7   :  { %v259_v46 = vpop.eup %258 }
 0x1a8   :  { %v182_v48 = vmul.f32 %v259_v46, %v181_v45 }
 0x1aa   :  { %v183_v49 = vadd.f32 %v182_v48, %v147_v47 }
 0x1ac   :  { %220 = vrot.lane.b32.xlu1 %v183_v49, %s261_s9  ;;  %249 = vmatmul.msk.f32.vlgmr.msrb.gmra.mxu1 %vm125_vm4, %v183_v49 }
 0x20f   :  { %v218_v53 = vpop.permute.xlu0 %217 }
 0x210   :  { %v227_v56 = vsel %vm125_vm4, %v147_v47, %v218_v53 }
 0x21e   :  { %v221_v54 = vpop.permute.xlu1 %220 }
 0x21f   :  { %v229_v58 = vsel %vm228_vm6, %v227_v56, %v221_v54 }
 0x229   :  { %v213_v51 = vpop.f32.mrf.mxu1 }
 0x22a   :  { %v214_v52 = vadd.f32 %v257_v50, %v213_v51 }
 0x22c   :  { %224 = vrot.lane.b32.xlu0 %v214_v52, %s262_s7 }
 0x29e   :  { %v225_v55 = vpop.permute.xlu0 %224 }
 0x29f   :  { %v233_v57 = vsel %vm232_vm5, %v225_v55, 0.0  ;;  %v231_v60 = vsel %vm230_vm7, %v229_v58, %v225_v55 }
 0x2a0   :  { %v236_v59 = vrot.slane %v233_v57, 6 }
 0x2a2   :  { %v238_v61 = vsel %vm237_vm8, %v231_v60, %v236_v59 }
 0x2a3   :  { %240 = vst [vmem:[%s449_s12] sm:$0xf] %v238_v61 }

// kernel: forward.15
= control target key start
LH: loop header
LB: loop body
LE: loop exit
PB: predicated region body
PF: predicated region fallthrough
CT: control target
= control target key end

     0   :  { %vm56_vm0 = vcmask 261120   ;;  %vm100_vm1 = vcmask 130048   ;;  %vm105_vm2 = vcmask 123904   ;;  %s217_s1 = inlined_call_operand.vmem [shape: bf16[32,144], index: 1, kind: input, shape index: {}]   ;;  %s218_s0 = inlined_call_operand.vmem [shape: bf16[18,32], index: 0, kind: input, shape index: {}]   ;;  %s219_s2 = inlined_call_operand.vmem [shape: f32[1,144], index: 2, kind: input, shape index: {}]   ;;  %s220_s3 = inlined_call_operand.vmem [shape: f32[18,144], index: 3, kind: output, shape index: {}]  }
   0x1   :  { %v125_v0 = vld [vmem:[%s217_s1 + $0x10] sm:$0xf]  ;;  %v139_v1 = vld [vmem:[%s217_s1 + $0x14] sm:$0xf0]  ;;  %v138_v2 = vld [vmem:[%s217_s1 + $0x14] sm:$0xf] }
   0x2   :  { %v126_v3 = vor.u32 %v139_v1, %v125_v0  ;;  %v127_v4 = vld [vmem:[%s217_s1 + $0x18] sm:$0xf0]  ;;  %v117_v5 = vld [vmem:[%s217_s1] sm:$0xf]  ;;  %v137_v6 = vld [vmem:[%s217_s1 + $0x4] sm:$0xf0] }
   0x3   :  { %v130_v7 = vor.u32 %v138_v2, %v127_v4  ;;  %v136_v8 = vld [vmem:[%s217_s1 + $0x4] sm:$0xf]  ;;  %v119_v9 = vld [vmem:[%s217_s1 + $0x8] sm:$0xf0]  ;;  %v118_v10 = vor.u32 %v137_v6, %v117_v5  ;;  %v17_v11 = vld [vmem:[%s218_s0 + $0x8] sm:$0x1] }
   0x4   :  { %69 = vmatpush.bf16.msra.mxu0 %v126_v3  ;;  %140 = vmatpush.bf16.msra.mxu2 %v126_v3  ;;  %v122_v12 = vor.u32 %v136_v8, %v119_v9  ;;  %v33_v13 = vunpack.c.l.b16 %v17_v11  ;;  %v135_v14 = vld [vmem:[%s218_s0] sm:$0xff] }
   0x5   :  { %87 = vmatpush.bf16.msra.mxu1 %v130_v7  ;;  %142 = vmatpush.bf16.msra.mxu3 %v130_v7  ;;  %v22_v16 = vld [vmem:[%s219_s2] sm:$0x3] }
   0x6   :  { %v35_v15 = vpack.c.b16 %v33_v13, %v33_v13  ;;  %v24_v17 = vperm.slane %v22_v16, 0  ;;  %v25_v18 = vperm.slane %v22_v16, 1 }
   0x8   :  { %70 = vmatpush.bf16.msra.mxu0 %v118_v10  ;;  %141 = vmatpush.bf16.msra.mxu2 %v118_v10 }
   0x9   :  { %88 = vmatpush.bf16.msra.mxu1 %v122_v12  ;;  %143 = vmatpush.bf16.msra.mxu3 %v122_v12 }
   0xb   :  { %131 = vmatmul.msk.bf16.vlgmr.msra.gmra.mxu0 %vm56_vm0, %v135_v14  ;;  %132 = vmatmul.msk.bf16.vlgmr.msra.gmra.mxu2 %vm56_vm0, %v35_v15 }
   0xc   :  { %133 = vmatmul.msk.bf16.vlgmr.msra.gmra.mxu1 %vm56_vm0, %v135_v14  ;;  %134 = vmatmul.msk.bf16.vlgmr.msra.gmra.mxu3 %vm56_vm0, %v35_v15 }
  0x88   :  { %v72_v19 = vpop.f32.mrf.mxu0 }
  0x89   :  { %v73_v20 = vadd.f32 %v72_v19, %v24_v17  ;;  %v90_v21 = vpop.f32.mrf.mxu1 }
  0x8a   :  { %v91_v22 = vadd.f32 %v90_v21, %v25_v18 }
  0x8b   :  { %99 = vst [vmem:[%s220_s3] sm:$0xff] %v73_v20 }
  0x8c   :  { %101 = vst.msk [vmem:[%s220_s3 + $0x8] sm:$0xff] %vm100_vm1, %v91_v22 }
  0x8e   :  { %v77_v23 = vpop.f32.mrf.mxu2 }
  0x8f   :  { %v78_v24 = vadd.f32 %v77_v23, %v24_v17  ;;  %v95_v25 = vpop.f32.mrf.mxu3 }
  0x90   :  { %v96_v26 = vadd.f32 %v95_v25, %v25_v18  ;;  %v74_v27 = vpop.f32.mrf.mxu0 }
  0x91   :  { %104 = vst [vmem:[%s220_s3 + $0x20] sm:$0x3] %v78_v24  ;;  %v75_v28 = vadd.f32 %v74_v27, %v24_v17  ;;  %v92_v29 = vpop.f32.mrf.mxu1 }
  0x92   :  { %106 = vst.msk [vmem:[%s220_s3 + $0x28] sm:$0x3] %vm105_vm2, %v96_v26  ;;  %v93_v30 = vadd.f32 %v92_v29, %v25_v18 }
  0x93   :  { %102 = vst [vmem:[%s220_s3 + $0x10] sm:$0xff] %v75_v28 }
  0x94   :  { %103 = vst.msk [vmem:[%s220_s3 + $0x18] sm:$0xff] %vm100_vm1, %v93_v30 }
  0x96   :  { %v79_v31 = vpop.f32.mrf.mxu2 }
  0x97   :  { %v97_v32 = vpop.f32.mrf.mxu3 }

// kernel: forward.16
= control target key start
LH: loop header
LB: loop body
LE: loop exit
PB: predicated region body
PF: predicated region fallthrough
CT: control target
= control target key end

     0   :  { %vm73_vm0 = vcmask 130048   ;;  %vm138_vm1 = vcmask 588800   ;;  %vm151_vm2 = vcmask 582656   ;;  %s308_s1 = inlined_call_operand.vmem [shape: bf16[16,72], index: 1, kind: input, shape index: {}]   ;;  %s309_s0 = inlined_call_operand.vmem [shape: bf16[98,16], index: 0, kind: input, shape index: {}]   ;;  %s310_s2 = inlined_call_operand.vmem [shape: f32[1,72], index: 2, kind: input, shape index: {}]   ;;  %s311_s3 = inlined_call_operand.vmem [shape: f32[98,72], index: 3, kind: output, shape index: {}]  }
   0x1   :  { %v198_v0 = vld [vmem:[%s308_s1] sm:$0xff]  ;;  %v194_v2 = vld [vmem:[%s309_s0 + $0x10] sm:$0xff]  ;;  %v197_v3 = vld [vmem:[%s309_s0 + $0x28] sm:$0xff] }
   0x2   :  { %v192_v1 = vld [vmem:[%s309_s0] sm:$0xff]  ;;  %102 = vmatpush.bf16.msra.mxu0 %v198_v0  ;;  %199 = vmatpush.bf16.msra.mxu1 %v198_v0  ;;  %v27_v5 = vld [vmem:[%s309_s0 + $0x30] sm:$0x1]  ;;  %v193_v7 = vld [vmem:[%s309_s0 + $0x8] sm:$0xff] }
   0x3   :  { %v196_v4 = vld [vmem:[%s309_s0 + $0x20] sm:$0xff]  ;;  %201 = vmatpush.bf16.msra.mxu3 %v198_v0  ;;  %200 = vmatpush.bf16.msra.mxu2 %v198_v0  ;;  %v59_v6 = vunpack.c.l.b16 %v27_v5  ;;  %v195_v8 = vld [vmem:[%s309_s0 + $0x18] sm:$0xff] }
   0x4   :  { %v202_v10 = vld [vmem:[%s310_s2] ss:$0 sm:$0xff] }
   0x5   :  { %185 = vmatmul.msk.bf16.vlgmr.msra.gmra.mxu0 %vm73_vm0, %v192_v1  ;;  %187 = vmatmul.msk.bf16.vlgmr.msra.gmra.mxu1 %vm73_vm0, %v194_v2  ;;  %v66_v9 = vpack.c.b16 %v59_v6, %v59_v6 }
   0x6   :  { %190 = vmatmul.msk.bf16.vlgmr.msra.gmra.mxu3 %vm73_vm0, %v197_v3  ;;  %189 = vmatmul.msk.bf16.vlgmr.msra.gmra.mxu2 %vm73_vm0, %v196_v4 }
  0x15   :  { %186 = vmatmul.msk.bf16.gmra.mxu0 %vm73_vm0, %v193_v7  ;;  %188 = vmatmul.msk.bf16.gmra.mxu1 %vm73_vm0, %v195_v8 }
  0x16   :  { %191 = vmatmul.msk.bf16.gmra.mxu3 %vm73_vm0, %v66_v9 }
  0x82   :  { %v104_v11 = vpop.f32.mrf.mxu0  ;;  %v114_v12 = vpop.f32.mrf.mxu1 }
  0x83   :  { %v105_v13 = vadd.f32 %v202_v10, %v104_v11  ;;  %v115_v14 = vadd.f32 %v202_v10, %v114_v12 }
  0x85   :  { %139 = vst.msk [vmem:[%s311_s3] sm:$0xff] %vm138_vm1, %v105_v13 }
  0x86   :  { %143 = vst.msk [vmem:[%s311_s3 + $0x20] sm:$0xff] %vm138_vm1, %v115_v14 }
  0x89   :  { %v129_v15 = vpop.f32.mrf.mxu3  ;;  %v124_v16 = vpop.f32.mrf.mxu2 }
  0x8a   :  { %v130_v17 = vadd.f32 %v202_v10, %v129_v15  ;;  %v106_v18 = vpop.f32.mrf.mxu0  ;;  %v116_v19 = vpop.f32.mrf.mxu1  ;;  %v125_v22 = vadd.f32 %v202_v10, %v124_v16 }
  0x8b   :  { %v107_v20 = vadd.f32 %v202_v10, %v106_v18  ;;  %v117_v21 = vadd.f32 %v202_v10, %v116_v19 }
  0x8c   :  { %149 = vst.msk [vmem:[%s311_s3 + $0x50] sm:$0xff] %vm138_vm1, %v130_v17 }
  0x8d   :  { %140 = vst.msk [vmem:[%s311_s3 + $0x8] sm:$0xff] %vm138_vm1, %v107_v20 }
  0x8e   :  { %144 = vst.msk [vmem:[%s311_s3 + $0x28] sm:$0xff] %vm138_vm1, %v117_v21 }
  0x8f   :  { %147 = vst.msk [vmem:[%s311_s3 + $0x40] sm:$0xff] %vm138_vm1, %v125_v22 }
  0x91   :  { %v131_v23 = vpop.f32.mrf.mxu3  ;;  %v126_v24 = vpop.f32.mrf.mxu2 }
  0x92   :  { %v132_v25 = vadd.f32 %v202_v10, %v131_v23  ;;  %v109_v26 = vpop.f32.mrf.mxu0  ;;  %v119_v27 = vpop.f32.mrf.mxu1  ;;  %v127_v30 = vadd.f32 %v202_v10, %v126_v24 }
  0x93   :  { %v110_v28 = vadd.f32 %v202_v10, %v109_v26  ;;  %v120_v29 = vadd.f32 %v202_v10, %v119_v27 }
  0x94   :  { %150 = vst.msk [vmem:[%s311_s3 + $0x58] sm:$0xff] %vm138_vm1, %v132_v25 }
  0x95   :  { %141 = vst.msk [vmem:[%s311_s3 + $0x10] sm:$0xff] %vm138_vm1, %v110_v28 }
  0x96   :  { %145 = vst.msk [vmem:[%s311_s3 + $0x30] sm:$0xff] %vm138_vm1, %v120_v29 }
  0x97   :  { %148 = vst.msk [vmem:[%s311_s3 + $0x48] sm:$0xff] %vm138_vm1, %v127_v30 }
  0x99   :  { %v134_v31 = vpop.f32.mrf.mxu3 }
  0x9a   :  { %v135_v32 = vadd.f32 %v202_v10, %v134_v31  ;;  %v111_v33 = vpop.f32.mrf.mxu0  ;;  %v121_v34 = vpop.f32.mrf.mxu1 }
  0x9b   :  { %v112_v35 = vadd.f32 %v202_v10, %v111_v33  ;;  %v122_v36 = vadd.f32 %v202_v10, %v121_v34 }
  0x9c   :  { %152 = vst.msk [vmem:[%s311_s3 + $0x60] sm:$0x3] %vm151_vm2, %v135_v32 }
  0x9d   :  { %142 = vst.msk [vmem:[%s311_s3 + $0x18] sm:$0xff] %vm138_vm1, %v112_v35 }
  0x9e   :  { %146 = vst.msk [vmem:[%s311_s3 + $0x38] sm:$0xff] %vm138_vm1, %v122_v36 }
  0xa1   :  { %v136_v37 = vpop.f32.mrf.mxu3 }

// kernel: forward.17
= control target key start
LH: loop header
LB: loop body
LE: loop exit
PB: predicated region body
PF: predicated region fallthrough
CT: control target
= control target key end

     0   :  { %vm308_vm0 = vcmask 1043456   ;;  %vm220_vm1 = vcmask 64512   ;;  %vm465_vm2 = vcmask 72704   ;;  %vm522_vm3 = vcmask 66560   ;;  %s1129_s1 = inlined_call_operand.vmem [shape: bf16[8,9], index: 1, kind: input, shape index: {}]   ;;  %s1130_s0 = inlined_call_operand.vmem [shape: bf16[450,8], index: 0, kind: input, shape index: {}]   ;;  %s1131_s2 = inlined_call_operand.vmem [shape: f32[1,9], index: 2, kind: input, shape index: {}]   ;;  %s1132_s3 = inlined_call_operand.vmem [shape: f32[450,9], index: 3, kind: output, shape index: {}]  }
   0x1   :  { %v72_v0 = vld [vmem:[%s1129_s1] sm:$0xf]  ;;  %v670_v6 = vld [vmem:[%s1130_s0 + $0x8] sm:$0xff]  ;;  %v671_v10 = vld [vmem:[%s1130_s0 + $0x10] sm:$0xff] }
   0x2   :  { %v310_v1 = vsel %vm308_vm0, %v72_v0, 0  ;;  %v669_v2 = vld [vmem:[%s1130_s0] sm:$0xff]  ;;  %v678_v7 = vld [vmem:[%s1130_s0 + $0x48] sm:$0xff]  ;;  %v679_v11 = vld [vmem:[%s1130_s0 + $0x50] sm:$0xff] }
   0x3   :  { %v677_v3 = vld [vmem:[%s1130_s0 + $0x40] sm:$0xff]  ;;  %319 = vmatpush.bf16.msra.mxu0 %v310_v1  ;;  %697 = vmatpush.bf16.msra.mxu1 %v310_v1  ;;  %v686_v8 = vld [vmem:[%s1130_s0 + $0x88] sm:$0xff]  ;;  %v687_v12 = vld [vmem:[%s1130_s0 + $0x90] sm:$0xff] }
   0x4   :  { %v685_v4 = vld [vmem:[%s1130_s0 + $0x80] sm:$0xff]  ;;  %698 = vmatpush.bf16.msra.mxu2 %v310_v1  ;;  %699 = vmatpush.bf16.msra.mxu3 %v310_v1  ;;  %v694_v9 = vld [vmem:[%s1130_s0 + $0xc8] sm:$0xff]  ;;  %v695_v13 = vld [vmem:[%s1130_s0 + $0xd0] sm:$0xff] }
   0x5   :  { %v693_v5 = vld [vmem:[%s1130_s0 + $0xc0] sm:$0xff]  ;;  %v672_v14 = vld [vmem:[%s1130_s0 + $0x18] sm:$0xff]  ;;  %v674_v24 = vld [vmem:[%s1130_s0 + $0x28] sm:$0xff] }
   0x6   :  { %640 = vmatmul.msk.bf16.vlgmr.msra.gmra.mxu0 %vm220_vm1, %v669_v2  ;;  %648 = vmatmul.msk.bf16.vlgmr.msra.gmra.mxu1 %vm220_vm1, %v677_v3  ;;  %v680_v15 = vld [vmem:[%s1130_s0 + $0x58] sm:$0xff]  ;;  %v673_v18 = vld [vmem:[%s1130_s0 + $0x20] sm:$0xff]  ;;  %v682_v25 = vld [vmem:[%s1130_s0 + $0x68] sm:$0xff] }
   0x7   :  { %656 = vmatmul.msk.bf16.vlgmr.msra.gmra.mxu2 %vm220_vm1, %v685_v4  ;;  %664 = vmatmul.msk.bf16.vlgmr.msra.gmra.mxu3 %vm220_vm1, %v693_v5  ;;  %v688_v16 = vld [vmem:[%s1130_s0 + $0x98] sm:$0xff]  ;;  %v681_v19 = vld [vmem:[%s1130_s0 + $0x60] sm:$0xff]  ;;  %v690_v26 = vld [vmem:[%s1130_s0 + $0xa8] sm:$0xff] }
   0x8   :  { %v696_v17 = vld [vmem:[%s1130_s0 + $0xd8] sm:$0xff]  ;;  %v689_v20 = vld [vmem:[%s1130_s0 + $0xa0] sm:$0xff]  ;;  %v675_v27 = vld [vmem:[%s1130_s0 + $0x30] sm:$0xff] }
   0x9   :  { %v71_v21 = vld [vmem:[%s1130_s0 + $0xe0] sm:$0x1]  ;;  %v683_v28 = vld [vmem:[%s1130_s0 + $0x70] sm:$0xff]  ;;  %v676_v30 = vld [vmem:[%s1130_s0 + $0x38] sm:$0xff] }
   0xa   :  { %v190_v22 = vunpack.c.l.b16 %v71_v21  ;;  %v691_v29 = vld [vmem:[%s1130_s0 + $0xb0] sm:$0xff]  ;;  %v684_v31 = vld [vmem:[%s1130_s0 + $0x78] sm:$0xff]  ;;  %v843_v33 = vld [vmem:[%s1131_s2] ss:$0 sm:$0xff] }
   0xb   :  { %v692_v32 = vld [vmem:[%s1130_s0 + $0xb8] sm:$0xff] }
   0xc   :  { %v219_v23 = vpack.c.b16 %v190_v22, %v190_v22 }
  0x16   :  { %641 = vmatmul.msk.bf16.gmra.mxu0 %vm220_vm1, %v670_v6  ;;  %649 = vmatmul.msk.bf16.gmra.mxu1 %vm220_vm1, %v678_v7 }
  0x17   :  { %657 = vmatmul.msk.bf16.gmra.mxu2 %vm220_vm1, %v686_v8  ;;  %665 = vmatmul.msk.bf16.gmra.mxu3 %vm220_vm1, %v694_v9 }
  0x26   :  { %642 = vmatmul.msk.bf16.gmra.mxu0 %vm220_vm1, %v671_v10  ;;  %650 = vmatmul.msk.bf16.gmra.mxu1 %vm220_vm1, %v679_v11 }
  0x27   :  { %658 = vmatmul.msk.bf16.gmra.mxu2 %vm220_vm1, %v687_v12  ;;  %666 = vmatmul.msk.bf16.gmra.mxu3 %vm220_vm1, %v695_v13 }
  0x36   :  { %643 = vmatmul.msk.bf16.gmra.mxu0 %vm220_vm1, %v672_v14  ;;  %651 = vmatmul.msk.bf16.gmra.mxu1 %vm220_vm1, %v680_v15 }
  0x37   :  { %659 = vmatmul.msk.bf16.gmra.mxu2 %vm220_vm1, %v688_v16  ;;  %667 = vmatmul.msk.bf16.gmra.mxu3 %vm220_vm1, %v696_v17 }
  0x46   :  { %644 = vmatmul.msk.bf16.gmra.mxu0 %vm220_vm1, %v673_v18  ;;  %652 = vmatmul.msk.bf16.gmra.mxu1 %vm220_vm1, %v681_v19 }
  0x47   :  { %660 = vmatmul.msk.bf16.gmra.mxu2 %vm220_vm1, %v689_v20  ;;  %668 = vmatmul.msk.bf16.gmra.mxu3 %vm220_vm1, %v219_v23 }
  0x56   :  { %645 = vmatmul.msk.bf16.gmra.mxu0 %vm220_vm1, %v674_v24  ;;  %653 = vmatmul.msk.bf16.gmra.mxu1 %vm220_vm1, %v682_v25 }
  0x57   :  { %661 = vmatmul.msk.bf16.gmra.mxu2 %vm220_vm1, %v690_v26 }
  0x66   :  { %646 = vmatmul.msk.bf16.gmra.mxu0 %vm220_vm1, %v675_v27  ;;  %654 = vmatmul.msk.bf16.gmra.mxu1 %vm220_vm1, %v683_v28 }
  0x67   :  { %662 = vmatmul.msk.bf16.gmra.mxu2 %vm220_vm1, %v691_v29 }
  0x76   :  { %647 = vmatmul.msk.bf16.gmra.mxu0 %vm220_vm1, %v676_v30  ;;  %655 = vmatmul.msk.bf16.gmra.mxu1 %vm220_vm1, %v684_v31 }
  0x77   :  { %663 = vmatmul.msk.bf16.gmra.mxu2 %vm220_vm1, %v692_v32 }
  0x83   :  { %v321_v34 = vpop.f32.mrf.mxu0  ;;  %v361_v35 = vpop.f32.mrf.mxu1 }
  0x84   :  { %v322_v36 = vadd.f32 %v843_v33, %v321_v34  ;;  %v362_v37 = vadd.f32 %v843_v33, %v361_v35 }
  0x86   :  { %466 = vst.msk [vmem:[%s1132_s3] sm:$0xff] %vm465_vm2, %v322_v36 }
  0x87   :  { %482 = vst.msk [vmem:[%s1132_s3 + $0x80] sm:$0xff] %vm465_vm2, %v362_v37 }
  0x8a   :  { %v401_v38 = vpop.f32.mrf.mxu2  ;;  %v441_v50 = vpop.f32.mrf.mxu3 }
  0x8b   :  { %v402_v39 = vadd.f32 %v843_v33, %v401_v38  ;;  %v323_v40 = vpop.f32.mrf.mxu0  ;;  %v363_v41 = vpop.f32.mrf.mxu1  ;;  %v442_v51 = vadd.f32 %v843_v33, %v441_v50 }
  0x8c   :  { %v324_v42 = vadd.f32 %v843_v33, %v323_v40  ;;  %v364_v43 = vadd.f32 %v843_v33, %v363_v41 }
  0x8d   :  { %498 = vst.msk [vmem:[%s1132_s3 + $0x100] sm:$0xff] %vm465_vm2, %v402_v39 }
  0x8e   :  { %467 = vst.msk [vmem:[%s1132_s3 + $0x8] sm:$0xff] %vm465_vm2, %v324_v42 }
  0x8f   :  { %483 = vst.msk [vmem:[%s1132_s3 + $0x88] sm:$0xff] %vm465_vm2, %v364_v43 }
  0x90   :  { %514 = vst.msk [vmem:[%s1132_s3 + $0x180] sm:$0xff] %vm465_vm2, %v442_v51 }
  0x92   :  { %v403_v44 = vpop.f32.mrf.mxu2  ;;  %v443_v58 = vpop.f32.mrf.mxu3 }
  0x93   :  { %v404_v45 = vadd.f32 %v843_v33, %v403_v44  ;;  %v326_v46 = vpop.f32.mrf.mxu0  ;;  %v366_v47 = vpop.f32.mrf.mxu1  ;;  %v444_v59 = vadd.f32 %v843_v33, %v443_v58 }
  0x94   :  { %v327_v48 = vadd.f32 %v843_v33, %v326_v46  ;;  %v367_v49 = vadd.f32 %v843_v33, %v366_v47 }
  0x95   :  { %499 = vst.msk [vmem:[%s1132_s3 + $0x108] sm:$0xff] %vm465_vm2, %v404_v45 }
  0x96   :  { %468 = vst.msk [vmem:[%s1132_s3 + $0x10] sm:$0xff] %vm465_vm2, %v327_v48 }
  0x97   :  { %484 = vst.msk [vmem:[%s1132_s3 + $0x90] sm:$0xff] %vm465_vm2, %v367_v49 }
  0x98   :  { %515 = vst.msk [vmem:[%s1132_s3 + $0x188] sm:$0xff] %vm465_vm2, %v444_v59 }
  0x9a   :  { %v406_v52 = vpop.f32.mrf.mxu2  ;;  %v446_v2 = vpop.f32.mrf.mxu3 }
  0x9b   :  { %v407_v53 = vadd.f32 %v843_v33, %v406_v52  ;;  %v328_v54 = vpop.f32.mrf.mxu0  ;;  %v368_v55 = vpop.f32.mrf.mxu1  ;;  %v447_v3 = vadd.f32 %v843_v33, %v446_v2 }
  0x9c   :  { %v329_v56 = vadd.f32 %v843_v33, %v328_v54  ;;  %v369_v57 = vadd.f32 %v843_v33, %v368_v55 }
  0x9d   :  { %500 = vst.msk [vmem:[%s1132_s3 + $0x110] sm:$0xff] %vm465_vm2, %v407_v53 }
  0x9e   :  { %469 = vst.msk [vmem:[%s1132_s3 + $0x18] sm:$0xff] %vm465_vm2, %v329_v56 }
  0x9f   :  { %485 = vst.msk [vmem:[%s1132_s3 + $0x98] sm:$0xff] %vm465_vm2, %v369_v57 }
  0xa0   :  { %516 = vst.msk [vmem:[%s1132_s3 + $0x190] sm:$0xff] %vm465_vm2, %v447_v3 }
  0xa2   :  { %v408_v60 = vpop.f32.mrf.mxu2  ;;  %v448_v10 = vpop.f32.mrf.mxu3 }
  0xa3   :  { %v409_v61 = vadd.f32 %v843_v33, %v408_v60  ;;  %v331_v62 = vpop.f32.mrf.mxu0  ;;  %v371_v63 = vpop.f32.mrf.mxu1  ;;  %v449_v11 = vadd.f32 %v843_v33, %v448_v10 }
  0xa4   :  { %v332_v0 = vadd.f32 %v843_v33, %v331_v62  ;;  %v372_v1 = vadd.f32 %v843_v33, %v371_v63 }
  0xa5   :  { %501 = vst.msk [vmem:[%s1132_s3 + $0x118] sm:$0xff] %vm465_vm2, %v409_v61 }
  0xa6   :  { %470 = vst.msk [vmem:[%s1132_s3 + $0x20] sm:$0xff] %vm465_vm2, %v332_v0 }
  0xa7   :  { %486 = vst.msk [vmem:[%s1132_s3 + $0xa0] sm:$0xff] %vm465_vm2, %v372_v1 }
  0xa8   :  { %517 = vst.msk [vmem:[%s1132_s3 + $0x198] sm:$0xff] %vm465_vm2, %v449_v11 }
  0xaa   :  { %v411_v4 = vpop.f32.mrf.mxu2  ;;  %v451_v18 = vpop.f32.mrf.mxu3 }
  0xab   :  { %v412_v5 = vadd.f32 %v843_v33, %v411_v4  ;;  %v333_v6 = vpop.f32.mrf.mxu0  ;;  %v373_v7 = vpop.f32.mrf.mxu1  ;;  %v452_v19 = vadd.f32 %v843_v33, %v451_v18 }
  0xac   :  { %v334_v8 = vadd.f32 %v843_v33, %v333_v6  ;;  %v374_v9 = vadd.f32 %v843_v33, %v373_v7 }
  0xad   :  { %502 = vst.msk [vmem:[%s1132_s3 + $0x120] sm:$0xff] %vm465_vm2, %v412_v5 }
  0xae   :  { %471 = vst.msk [vmem:[%s1132_s3 + $0x28] sm:$0xff] %vm465_vm2, %v334_v8 }
  0xaf   :  { %487 = vst.msk [vmem:[%s1132_s3 + $0xa8] sm:$0xff] %vm465_vm2, %v374_v9 }
  0xb0   :  { %518 = vst.msk [vmem:[%s1132_s3 + $0x1a0] sm:$0xff] %vm465_vm2, %v452_v19 }
  0xb2   :  { %v413_v12 = vpop.f32.mrf.mxu2  ;;  %v453_v26 = vpop.f32.mrf.mxu3 }
  0xb3   :  { %v414_v13 = vadd.f32 %v843_v33, %v413_v12  ;;  %v336_v14 = vpop.f32.mrf.mxu0  ;;  %v376_v15 = vpop.f32.mrf.mxu1  ;;  %v454_v27 = vadd.f32 %v843_v33, %v453_v26 }
  0xb4   :  { %v337_v16 = vadd.f32 %v843_v33, %v336_v14  ;;  %v377_v17 = vadd.f32 %v843_v33, %v376_v15 }
  0xb5   :  { %503 = vst.msk [vmem:[%s1132_s3 + $0x128] sm:$0xff] %vm465_vm2, %v414_v13 }
  0xb6   :  { %472 = vst.msk [vmem:[%s1132_s3 + $0x30] sm:$0xff] %vm465_vm2, %v337_v16 }
  0xb7   :  { %488 = vst.msk [vmem:[%s1132_s3 + $0xb0] sm:$0xff] %vm465_vm2, %v377_v17 }
  0xb8   :  { %519 = vst.msk [vmem:[%s1132_s3 + $0x1a8] sm:$0xff] %vm465_vm2, %v454_v27 }
  0xba   :  { %v416_v20 = vpop.f32.mrf.mxu2  ;;  %v456_v35 = vpop.f32.mrf.mxu3 }
  0xbb   :  { %v417_v21 = vadd.f32 %v843_v33, %v416_v20  ;;  %v338_v22 = vpop.f32.mrf.mxu0  ;;  %v378_v23 = vpop.f32.mrf.mxu1  ;;  %v457_v36 = vadd.f32 %v843_v33, %v456_v35 }
  0xbc   :  { %v339_v24 = vadd.f32 %v843_v33, %v338_v22  ;;  %v379_v25 = vadd.f32 %v843_v33, %v378_v23 }
  0xbd   :  { %504 = vst.msk [vmem:[%s1132_s3 + $0x130] sm:$0xff] %vm465_vm2, %v417_v21 }
  0xbe   :  { %473 = vst.msk [vmem:[%s1132_s3 + $0x38] sm:$0xff] %vm465_vm2, %v339_v24 }
  0xbf   :  { %489 = vst.msk [vmem:[%s1132_s3 + $0xb8] sm:$0xff] %vm465_vm2, %v379_v25 }
  0xc0   :  { %520 = vst.msk [vmem:[%s1132_s3 + $0x1b0] sm:$0xff] %vm465_vm2, %v457_v36 }
  0xc2   :  { %v418_v28 = vpop.f32.mrf.mxu2  ;;  %v458_v43 = vpop.f32.mrf.mxu3 }
  0xc3   :  { %v419_v29 = vadd.f32 %v843_v33, %v418_v28  ;;  %v341_v30 = vpop.f32.mrf.mxu0  ;;  %v381_v31 = vpop.f32.mrf.mxu1  ;;  %v459_v44 = vadd.f32 %v843_v33, %v458_v43 }
  0xc4   :  { %v342_v32 = vadd.f32 %v843_v33, %v341_v30  ;;  %v382_v34 = vadd.f32 %v843_v33, %v381_v31 }
  0xc5   :  { %505 = vst.msk [vmem:[%s1132_s3 + $0x138] sm:$0xff] %vm465_vm2, %v419_v29 }
  0xc6   :  { %474 = vst.msk [vmem:[%s1132_s3 + $0x40] sm:$0xff] %vm465_vm2, %v342_v32 }
  0xc7   :  { %490 = vst.msk [vmem:[%s1132_s3 + $0xc0] sm:$0xff] %vm465_vm2, %v382_v34 }
  0xc8   :  { %521 = vst.msk [vmem:[%s1132_s3 + $0x1b8] sm:$0xff] %vm465_vm2, %v459_v44 }
  0xca   :  { %v421_v37 = vpop.f32.mrf.mxu2  ;;  %v461_v51 = vpop.f32.mrf.mxu3 }
  0xcb   :  { %v422_v38 = vadd.f32 %v843_v33, %v421_v37  ;;  %v343_v39 = vpop.f32.mrf.mxu0  ;;  %v383_v40 = vpop.f32.mrf.mxu1  ;;  %v462_v52 = vadd.f32 %v843_v33, %v461_v51 }
  0xcc   :  { %v344_v41 = vadd.f32 %v843_v33, %v343_v39  ;;  %v384_v42 = vadd.f32 %v843_v33, %v383_v40 }
  0xcd   :  { %506 = vst.msk [vmem:[%s1132_s3 + $0x140] sm:$0xff] %vm465_vm2, %v422_v38 }
  0xce   :  { %475 = vst.msk [vmem:[%s1132_s3 + $0x48] sm:$0xff] %vm465_vm2, %v344_v41 }
  0xcf   :  { %491 = vst.msk [vmem:[%s1132_s3 + $0xc8] sm:$0xff] %vm465_vm2, %v384_v42 }
  0xd0   :  { %523 = vst.msk [vmem:[%s1132_s3 + $0x1c0] sm:$0x3] %vm522_vm3, %v462_v52 }
  0xd2   :  { %v423_v45 = vpop.f32.mrf.mxu2  ;;  %v463_v59 = vpop.f32.mrf.mxu3 }
  0xd3   :  { %v424_v46 = vadd.f32 %v843_v33, %v423_v45  ;;  %v346_v47 = vpop.f32.mrf.mxu0  ;;  %v386_v48 = vpop.f32.mrf.mxu1 }
  0xd4   :  { %v347_v49 = vadd.f32 %v843_v33, %v346_v47  ;;  %v387_v50 = vadd.f32 %v843_v33, %v386_v48 }
  0xd5   :  { %507 = vst.msk [vmem:[%s1132_s3 + $0x148] sm:$0xff] %vm465_vm2, %v424_v46 }
  0xd6   :  { %476 = vst.msk [vmem:[%s1132_s3 + $0x50] sm:$0xff] %vm465_vm2, %v347_v49 }
  0xd7   :  { %492 = vst.msk [vmem:[%s1132_s3 + $0xd0] sm:$0xff] %vm465_vm2, %v387_v50 }
  0xda   :  { %v426_v53 = vpop.f32.mrf.mxu2 }
  0xdb   :  { %v427_v54 = vadd.f32 %v843_v33, %v426_v53  ;;  %v348_v55 = vpop.f32.mrf.mxu0  ;;  %v388_v56 = vpop.f32.mrf.mxu1 }
  0xdc   :  { %v349_v57 = vadd.f32 %v843_v33, %v348_v55  ;;  %v389_v58 = vadd.f32 %v843_v33, %v388_v56 }
  0xdd   :  { %508 = vst.msk [vmem:[%s1132_s3 + $0x150] sm:$0xff] %vm465_vm2, %v427_v54 }
  0xde   :  { %477 = vst.msk [vmem:[%s1132_s3 + $0x58] sm:$0xff] %vm465_vm2, %v349_v57 }
  0xdf   :  { %493 = vst.msk [vmem:[%s1132_s3 + $0xd8] sm:$0xff] %vm465_vm2, %v389_v58 }
  0xe2   :  { %v428_v60 = vpop.f32.mrf.mxu2 }
  0xe3   :  { %v429_v61 = vadd.f32 %v843_v33, %v428_v60  ;;  %v351_v62 = vpop.f32.mrf.mxu0  ;;  %v391_v63 = vpop.f32.mrf.mxu1 }
  0xe4   :  { %v352_v0 = vadd.f32 %v843_v33, %v351_v62  ;;  %v392_v1 = vadd.f32 %v843_v33, %v391_v63 }
  0xe5   :  { %509 = vst.msk [vmem:[%s1132_s3 + $0x158] sm:$0xff] %vm465_vm2, %v429_v61 }
  0xe6   :  { %478 = vst.msk [vmem:[%s1132_s3 + $0x60] sm:$0xff] %vm465_vm2, %v352_v0 }
  0xe7   :  { %494 = vst.msk [vmem:[%s1132_s3 + $0xe0] sm:$0xff] %vm465_vm2, %v392_v1 }
  0xea   :  { %v431_v2 = vpop.f32.mrf.mxu2 }
  0xeb   :  { %v432_v3 = vadd.f32 %v843_v33, %v431_v2  ;;  %v353_v4 = vpop.f32.mrf.mxu0  ;;  %v393_v5 = vpop.f32.mrf.mxu1 }
  0xec   :  { %v354_v6 = vadd.f32 %v843_v33, %v353_v4  ;;  %v394_v7 = vadd.f32 %v843_v33, %v393_v5 }
  0xed   :  { %510 = vst.msk [vmem:[%s1132_s3 + $0x160] sm:$0xff] %vm465_vm2, %v432_v3 }
  0xee   :  { %479 = vst.msk [vmem:[%s1132_s3 + $0x68] sm:$0xff] %vm465_vm2, %v354_v6 }
  0xef   :  { %495 = vst.msk [vmem:[%s1132_s3 + $0xe8] sm:$0xff] %vm465_vm2, %v394_v7 }
  0xf2   :  { %v433_v8 = vpop.f32.mrf.mxu2 }
  0xf3   :  { %v434_v9 = vadd.f32 %v843_v33, %v433_v8  ;;  %v356_v10 = vpop.f32.mrf.mxu0  ;;  %v396_v11 = vpop.f32.mrf.mxu1 }
  0xf4   :  { %v357_v12 = vadd.f32 %v843_v33, %v356_v10  ;;  %v397_v13 = vadd.f32 %v843_v33, %v396_v11 }
  0xf5   :  { %511 = vst.msk [vmem:[%s1132_s3 + $0x168] sm:$0xff] %vm465_vm2, %v434_v9 }
  0xf6   :  { %480 = vst.msk [vmem:[%s1132_s3 + $0x70] sm:$0xff] %vm465_vm2, %v357_v12 }
  0xf7   :  { %496 = vst.msk [vmem:[%s1132_s3 + $0xf0] sm:$0xff] %vm465_vm2, %v397_v13 }
  0xfa   :  { %v436_v14 = vpop.f32.mrf.mxu2 }
  0xfb   :  { %v437_v15 = vadd.f32 %v843_v33, %v436_v14  ;;  %v358_v16 = vpop.f32.mrf.mxu0  ;;  %v398_v17 = vpop.f32.mrf.mxu1 }
  0xfc   :  { %v359_v18 = vadd.f32 %v843_v33, %v358_v16  ;;  %v399_v19 = vadd.f32 %v843_v33, %v398_v17 }
  0xfd   :  { %512 = vst.msk [vmem:[%s1132_s3 + $0x170] sm:$0xff] %vm465_vm2, %v437_v15 }
  0xfe   :  { %481 = vst.msk [vmem:[%s1132_s3 + $0x78] sm:$0xff] %vm465_vm2, %v359_v18 }
  0xff   :  { %497 = vst.msk [vmem:[%s1132_s3 + $0xf8] sm:$0xff] %vm465_vm2, %v399_v19 }
 0x102   :  { %v438_v20 = vpop.f32.mrf.mxu2 }
 0x103   :  { %v439_v21 = vadd.f32 %v843_v33, %v438_v20 }
 0x105   :  { %513 = vst.msk [vmem:[%s1132_s3 + $0x178] sm:$0xff] %vm465_vm2, %v439_v21 }

</bundles_post_ra>
